<compile_context>
chip_gen: v7x
topology: tpu7x:2x2x1
jax: 0.10.0
libtpu: 0.0.40
codegen_flags: <defaults>
</compile_context>

<pallas_src>
import functools
import math

import numpy as np
import jax
import jax.numpy as jnp
from jax import lax
from jax.experimental import pallas as pl
from jax.experimental.pallas import tpu as pltpu


def _round_up(x, m):
    return ((x + m - 1) // m) * m


# ----------------------------------------------------------------------------
# Kernel 1: conv1 (1 -> C, 3x3, stride 2) + ReLU, MXU formulation, output is
# written directly in the phase-split layout kernel 2 consumes.
#
# xt_ref : (1, 1, 4, TT2+2, Fxpad) f32  time-phase-split input tile (+2 halo)
#          xt[., ., rt, su, fx] = x[4*(TT2*k + su) + rt, fx]
# w1_ref : (3, 8, CP)             f32  per-time-tap weights; rows 0..2 hold the
#                                      3 frequency taps, rows 3..7 are zero
# b1_ref : (1, CP)                f32
# o_ref  : (1, 1, 4, F2p*UT, CP)  bf16
#          o[., ., 2p+q, v*UT+u, :] = relu(conv1(x))[2*(TT2*k+u)+p, 2v+q, :]
# ----------------------------------------------------------------------------
def _conv1_relu_kernel(xt_ref, w1_ref, b1_ref, o_ref, *, F2p, UT):
    CP = o_ref.shape[-1]
    for p in range(2):                       # output time phase
        for q in range(2):                   # output frequency phase
            ph = 2 * p + q
            for v in range(F2p):             # phase-split frequency column
                fx0 = 4 * v + 2 * q          # first input frequency tap
                acc = jnp.zeros((UT, CP), jnp.float32)
                for a in range(3):           # time tap
                    rt = (2 * p + a) % 4
                    da = (2 * p + a) // 4
                    lhs = xt_ref[0, 0, rt, da:da + UT, fx0:fx0 + 8]   # (UT, 8)
                    acc += jnp.dot(lhs, w1_ref[a],
                                   preferred_element_type=jnp.float32)
                y = jnp.maximum(acc + b1_ref[...], 0.0)
                o_ref[0, 0, ph, v * UT:(v + 1) * UT, :] = y.astype(o_ref.dtype)


# ----------------------------------------------------------------------------
# Kernel 2: conv2 (C -> C, 3x3, stride 2) + ReLU + Linear + PositionalEncoding.
# Grid (B, T2-tiles), both parallel; F2 reduction unrolled in-kernel; output
# block written once per step.
# ----------------------------------------------------------------------------
def _conv2_linear_posenc_kernel(yp_ref, w2_ref, b2_ref, wl_ref, bl_ref,
                                pe_ref, o_ref, *, F2, UT):
    _, TT2, CP = o_ref.shape
    out = pe_ref[...] + bl_ref[...]                       # (TT2, CP) f32
    for f2 in range(F2):
        acc = jnp.zeros((TT2, CP), jnp.float32)
        for i in range(3):                                # time tap
            for j in range(3):                            # frequency tap
                p, du = i % 2, i // 2
                q, dv = j % 2, j // 2
                base = (f2 + dv) * UT + du
                lhs = yp_ref[0, 0, 2 * p + q, base:base + TT2, :]   # (TT2, CP)
                acc += jnp.dot(lhs, w2_ref[3 * i + j],
                               preferred_element_type=jnp.float32)
        y2 = jnp.maximum(acc + b2_ref[...], 0.0).astype(jnp.bfloat16)
        out = out + jnp.dot(y2, wl_ref[f2], preferred_element_type=jnp.float32)
    o_ref[0] = out


# ----------------------------------------------------------------------------
# Glue: positional-encoding table, weight repacking, mask slicing.
# ----------------------------------------------------------------------------
def sinusoidal_pe(length, d_model):
    position = np.arange(length, dtype=np.float32)[:, None]
    div_term = np.exp(np.arange(0, d_model, 2, dtype=np.float32)
                      * -(math.log(10000.0) / d_model))
    pe = np.zeros((length, d_model), dtype=np.float32)
    pe[:, 0::2] = np.sin(position * div_term)
    pe[:, 1::2] = np.cos(position * div_term)
    return jnp.asarray(pe)


def conv2d_subsampling_forward(x, x_mask, params, odim, *, time_tile=128):
    """Pallas implementation of Conv2dSubsampling.forward.

    x:      (B, T, idim) float32
    x_mask: (B, 1, T) bool or None
    returns (y, mask) with y: (B, T'', odim)
    """
    w1, b1, w2, b2, w_lin, b_lin = params
    B, T, F = x.shape
    T1 = (T - 3) // 2 + 1
    F1 = (F - 3) // 2 + 1
    T2 = (T1 - 3) // 2 + 1
    F2 = (F1 - 3) // 2 + 1
    CP = _round_up(odim, 128)                # lane-dense channel padding
    F2p = F2 + 1                             # +1 frequency halo column

    TT2 = min(time_tile, _round_up(T2, 8))   # T2 rows per grid step
    n_k = (T2 + TT2 - 1) // TT2
    T2pad = n_k * TT2
    UT = TT2 + 1                             # +1 time halo row per tile

    # ---- time-tiled, time-phase-split (by 4) input with a 2-row halo --------
    Fxpad = _round_up(max(F, 4 * F2 + 10), 128)
    Sx = T2pad + 2
    xp = jnp.zeros((B, 4 * Sx, Fxpad), x.dtype).at[:, :T, :F].set(x)
    x4 = xp.reshape(B, Sx, 4, Fxpad)          # x4[b, s, rt] = x[b, 4s + rt]
    win = jnp.arange(n_k)[:, None] * TT2 + jnp.arange(TT2 + 2)[None, :]
    xt = jnp.transpose(x4[:, win], (0, 1, 3, 2, 4))   # (B, nk, 4, TT2+2, Fxpad)

    # ---- conv1 weights: one (8, CP) matrix per time tap ---------------------
    w1k = jnp.zeros((3, 8, CP), jnp.float32)
    w1k = w1k.at[:, 0:3, :odim].set(jnp.transpose(w1[:, 0], (1, 2, 0)))
    b1p = jnp.zeros((1, CP), jnp.float32).at[0, :odim].set(b1)

    yp = pl.pallas_call(
        functools.partial(_conv1_relu_kernel, F2p=F2p, UT=UT),
        out_shape=jax.ShapeDtypeStruct((B, n_k, 4, F2p * UT, CP), jnp.bfloat16),
        grid=(B, n_k),
        in_specs=[
            pl.BlockSpec((1, 1, 4, TT2 + 2, Fxpad),
                         lambda b, k: (b, k, 0, 0, 0)),
            pl.BlockSpec((3, 8, CP), lambda b, k: (0, 0, 0)),
            pl.BlockSpec((1, CP), lambda b, k: (0, 0)),
        ],
        out_specs=pl.BlockSpec((1, 1, 4, F2p * UT, CP),
                               lambda b, k: (b, k, 0, 0, 0)),
        compiler_params=pltpu.CompilerParams(
            dimension_semantics=("parallel", "parallel"),
            vmem_limit_bytes=64 * 1024 * 1024),
    )(xt, w1k, b1p)

    # ---- conv2 / linear weights (channel padded, bf16, xscale folded) -------
    w2p = jnp.zeros((9, CP, CP), jnp.float32)
    w2p = w2p.at[:, :odim, :odim].set(
        jnp.transpose(w2, (2, 3, 1, 0)).reshape(9, odim, odim))
    w2p = w2p.astype(jnp.bfloat16)
    b2p = jnp.zeros((1, CP), jnp.float32).at[0, :odim].set(b2)

    xscale = math.sqrt(odim)
    wl = jnp.transpose(w_lin.reshape(odim, odim, F2), (2, 1, 0)) * xscale
    wlp = jnp.zeros((F2, CP, CP), jnp.float32).at[:, :odim, :odim].set(wl)
    wlp = wlp.astype(jnp.bfloat16)
    blp = jnp.zeros((1, CP), jnp.float32).at[0, :odim].set(b_lin * xscale)
    pe = jnp.zeros((T2pad, CP), jnp.float32).at[:, :odim].set(
        sinusoidal_pe(T2pad, odim))

    cost = pl.CostEstimate(
        flops=2 * B * T2pad * F2 * 10 * CP * CP,
        transcendentals=0,
        bytes_accessed=(B * n_k * 4 * F2p * UT * CP * 2      # yp (bf16)
                        + (9 + F2) * CP * CP * 2             # weights (bf16)
                        + B * T2pad * CP * 4                  # output (f32)
                        + T2pad * CP * 4))                    # pe (f32)

    out = pl.pallas_call(
        functools.partial(_conv2_linear_posenc_kernel, F2=F2, UT=UT),
        out_shape=jax.ShapeDtypeStruct((B, T2pad, CP), jnp.float32),
        grid=(B, n_k),
        in_specs=[
            pl.BlockSpec((1, 1, 4, F2p * UT, CP),
                         lambda b, k: (b, k, 0, 0, 0)),
            pl.BlockSpec((9, CP, CP), lambda b, k: (0, 0, 0)),
            pl.BlockSpec((1, CP), lambda b, k: (0, 0)),
            pl.BlockSpec((F2, CP, CP), lambda b, k: (0, 0, 0)),
            pl.BlockSpec((1, CP), lambda b, k: (0, 0)),
            pl.BlockSpec((TT2, CP), lambda b, k: (k, 0)),
        ],
        out_specs=pl.BlockSpec((1, TT2, CP), lambda b, k: (b, k, 0)),
        compiler_params=pltpu.CompilerParams(
            dimension_semantics=("parallel", "parallel"),
            vmem_limit_bytes=64 * 1024 * 1024),
        cost_estimate=cost,
    )(yp, w2p, b2p, wlp, blp, pe)

    y = out[:, :T2, :odim]

    if x_mask is None:
        return y, None
    if x_mask.shape[1] == 1:
        return y, x_mask[:, :, :-2:2][:, :, :-2:2]
    return y, x_mask[:, :-2:2, :-2:2][:, :-2:2, :-2:2]


# ----------------------------------------------------------------------------
# Pure-JAX f32 reference (correctness check)
# ----------------------------------------------------------------------------
def reference_forward(x, params, odim):
    w1, b1, w2, b2, w_lin, b_lin = params
    xx = x[:, None, :, :]  # NCHW
    dn = ("NCHW", "OIHW", "NCHW")
    y = lax.conv_general_dilated(xx, w1, (2, 2), "VALID", dimension_numbers=dn)
    y = jnp.maximum(y + b1[None, :, None, None], 0.0)
    y = lax.conv_general_dilated(y, w2, (2, 2), "VALID", dimension_numbers=dn)
    y = jnp.maximum(y + b2[None, :, None, None], 0.0)
    b, c, t, f = y.shape
    y = jnp.transpose(y, (0, 2, 1, 3)).reshape(b, t, c * f)
    y = y @ w_lin.T + b_lin
    y = y * math.sqrt(odim) + sinusoidal_pe(t, odim)[None]
    return y


# ----------------------------------------------------------------------------
if __name__ == "__main__":
    B, T, idim, odim = 2, 16, 16, 32
    dropout_rate = 0.0  # PositionalEncoding dropout is identity at inference

    key = jax.random.PRNGKey(0)
    k = jax.random.split(key, 8)
    F2_static = ((idim - 1) // 2 - 1) // 2  # = 3 for idim=16

    # Deterministic synthetic parameters (shapes from the torch module __init__).
    w1 = 0.1 * jax.random.normal(k[0], (odim, 1, 3, 3), jnp.float32)
    b1 = 0.1 * jax.random.normal(k[1], (odim,), jnp.float32)
    w2 = 0.05 * jax.random.normal(k[2], (odim, odim, 3, 3), jnp.float32)
    b2 = 0.1 * jax.random.normal(k[3], (odim,), jnp.float32)
    w_lin = 0.05 * jax.random.normal(k[4], (odim, odim * F2_static), jnp.float32)
    b_lin = 0.1 * jax.random.normal(k[5], (odim,), jnp.float32)
    params = (w1, b1, w2, b2, w_lin, b_lin)

    x = jax.random.normal(k[6], (B, T, idim), jnp.float32)
    x_mask = jnp.ones((B, 1, T), dtype=bool)

    y, m = conv2d_subsampling_forward(x, x_mask, params, odim)
    y = jax.block_until_ready(y)
    m = jax.block_until_ready(m)

    y_ref = reference_forward(x, params, odim)
    # bf16 matmul operands with f32 accumulation -> loosened tolerance.
    np.testing.assert_allclose(np.asarray(y), np.asarray(y_ref),
                               atol=5e-2, rtol=5e-2)
    assert m.shape == (B, 1, ((T - 1) // 2 - 1) // 2)

    print("KERNEL_OK")
</pallas_src>

<mosaic_0001>
module attributes {stable_mosaic.version = 11 : i64} {
  func.func @_conv1_relu_kernel(%arg0: i32, %arg1: i32, %arg2: memref<1x1x4x10x128xf32, #tpu.memory_space<vmem>>, %arg3: memref<3x8x128xf32, #tpu.memory_space<vmem>>, %arg4: memref<1x128xf32, #tpu.memory_space<vmem>>, %arg5: memref<1x1x4x36x128xbf16, #tpu.memory_space<vmem>>) attributes {dimension_semantics = [#tpu.dimension_semantics<parallel>, #tpu.dimension_semantics<parallel>], iteration_bounds = array<i64: 2, 1>, scalar_prefetch = 0 : i64, scratch_operands = 0 : i64, tpu.core_type = #tpu.core_type<tc>, window_params = [{transform_indices = @transform_0, window_bounds = array<i64: 1, 1, 4, 10, 128>}, {pipeline_mode = #tpu.pipeline_mode<synchronous>, transform_indices = @transform_1, window_bounds = array<i64: 3, 8, 128>}, {pipeline_mode = #tpu.pipeline_mode<synchronous>, transform_indices = @transform_2, window_bounds = array<i64: 1, 128>}, {transform_indices = @transform_3, window_bounds = array<i64: 1, 1, 4, 36, 128>}]} {
    %cst = arith.constant 0.000000e+00 : f32
    %0 = vector.broadcast %cst : f32 to vector<9x128xf32>
    %c0 = arith.constant 0 : index
    %c0_0 = arith.constant 0 : index
    %c0_1 = arith.constant 0 : index
    %c0_2 = arith.constant 0 : index
    %c0_3 = arith.constant 0 : index
    %1 = vector.load %arg2[%c0, %c0_0, %c0_1, %c0_2, %c0_3] : memref<1x1x4x10x128xf32, #tpu.memory_space<vmem>>, vector<1x1x1x9x8xf32>
    %2 = vector.shape_cast %1 : vector<1x1x1x9x8xf32> to vector<9x8xf32>
    %c0_4 = arith.constant 0 : index
    %c0_5 = arith.constant 0 : index
    %c0_6 = arith.constant 0 : index
    %3 = vector.load %arg3[%c0_4, %c0_5, %c0_6] : memref<3x8x128xf32, #tpu.memory_space<vmem>>, vector<1x8x128xf32>
    %4 = vector.shape_cast %3 : vector<1x8x128xf32> to vector<8x128xf32>
    %cst_7 = arith.constant dense<0.000000e+00> : vector<9x128xf32>
    %5 = tpu.matmul %2, %4, %cst_7 {dimension_numbers = #tpu.dot_dimension_numbers<[1], [0], [0], [1], [0, 0, 1, 1], [], []>} : vector<9x8xf32>, vector<8x128xf32>, vector<9x128xf32> -> vector<9x128xf32>
    %6 = arith.addf %0, %5 : vector<9x128xf32>
    %c0_8 = arith.constant 0 : index
    %c0_9 = arith.constant 0 : index
    %c1 = arith.constant 1 : index
    %c0_10 = arith.constant 0 : index
    %c0_11 = arith.constant 0 : index
    %7 = vector.load %arg2[%c0_8, %c0_9, %c1, %c0_10, %c0_11] : memref<1x1x4x10x128xf32, #tpu.memory_space<vmem>>, vector<1x1x1x9x8xf32>
    %8 = vector.shape_cast %7 : vector<1x1x1x9x8xf32> to vector<9x8xf32>
    %c1_12 = arith.constant 1 : index
    %c0_13 = arith.constant 0 : index
    %c0_14 = arith.constant 0 : index
    %9 = vector.load %arg3[%c1_12, %c0_13, %c0_14] : memref<3x8x128xf32, #tpu.memory_space<vmem>>, vector<1x8x128xf32>
    %10 = vector.shape_cast %9 : vector<1x8x128xf32> to vector<8x128xf32>
    %cst_15 = arith.constant dense<0.000000e+00> : vector<9x128xf32>
    %11 = tpu.matmul %8, %10, %cst_15 {dimension_numbers = #tpu.dot_dimension_numbers<[1], [0], [0], [1], [0, 0, 1, 1], [], []>} : vector<9x8xf32>, vector<8x128xf32>, vector<9x128xf32> -> vector<9x128xf32>
    %12 = arith.addf %6, %11 : vector<9x128xf32>
    %c0_16 = arith.constant 0 : index
    %c0_17 = arith.constant 0 : index
    %c2 = arith.constant 2 : index
    %c0_18 = arith.constant 0 : index
    %c0_19 = arith.constant 0 : index
    %13 = vector.load %arg2[%c0_16, %c0_17, %c2, %c0_18, %c0_19] : memref<1x1x4x10x128xf32, #tpu.memory_space<vmem>>, vector<1x1x1x9x8xf32>
    %14 = vector.shape_cast %13 : vector<1x1x1x9x8xf32> to vector<9x8xf32>
    %c2_20 = arith.constant 2 : index
    %c0_21 = arith.constant 0 : index
    %c0_22 = arith.constant 0 : index
    %15 = vector.load %arg3[%c2_20, %c0_21, %c0_22] : memref<3x8x128xf32, #tpu.memory_space<vmem>>, vector<1x8x128xf32>
    %16 = vector.shape_cast %15 : vector<1x8x128xf32> to vector<8x128xf32>
    %cst_23 = arith.constant dense<0.000000e+00> : vector<9x128xf32>
    %17 = tpu.matmul %14, %16, %cst_23 {dimension_numbers = #tpu.dot_dimension_numbers<[1], [0], [0], [1], [0, 0, 1, 1], [], []>} : vector<9x8xf32>, vector<8x128xf32>, vector<9x128xf32> -> vector<9x128xf32>
    %18 = arith.addf %12, %17 : vector<9x128xf32>
    %c0_24 = arith.constant 0 : index
    %c0_25 = arith.constant 0 : index
    %19 = vector.load %arg4[%c0_24, %c0_25] : memref<1x128xf32, #tpu.memory_space<vmem>>, vector<1x128xf32>
    %20 = vector.broadcast %19 : vector<1x128xf32> to vector<9x128xf32>
    %21 = arith.addf %18, %20 : vector<9x128xf32>
    %cst_26 = arith.constant 0.000000e+00 : f32
    %22 = vector.broadcast %cst_26 : f32 to vector<9x128xf32>
    %23 = arith.maximumf %21, %22 : vector<9x128xf32>
    %24 = arith.truncf %23 : vector<9x128xf32> to vector<9x128xbf16>
    %c0_27 = arith.constant 0 : index
    %c0_28 = arith.constant 0 : index
    %c0_29 = arith.constant 0 : index
    %c0_30 = arith.constant 0 : index
    %c0_31 = arith.constant 0 : index
    %25 = vector.load %arg5[%c0_27, %c0_28, %c0_29, %c0_30, %c0_31] : memref<1x1x4x36x128xbf16, #tpu.memory_space<vmem>>, vector<1x1x1x9x128xbf16>
    %26 = vector.shape_cast %25 : vector<1x1x1x9x128xbf16> to vector<9x128xbf16>
    %27 = vector.shape_cast %24 : vector<9x128xbf16> to vector<1x1x1x9x128xbf16>
    tpu.vector_store %arg5[%c0_27, %c0_28, %c0_29, %c0_30, %c0_31], %27 {strides = array<i32>} : memref<1x1x4x36x128xbf16, #tpu.memory_space<vmem>>, vector<1x1x1x9x128xbf16>,
    %cst_32 = arith.constant 0.000000e+00 : f32
    %28 = vector.broadcast %cst_32 : f32 to vector<9x128xf32>
    %c0_33 = arith.constant 0 : index
    %c0_34 = arith.constant 0 : index
    %c0_35 = arith.constant 0 : index
    %c0_36 = arith.constant 0 : index
    %c4 = arith.constant 4 : index
    %29 = vector.load %arg2[%c0_33, %c0_34, %c0_35, %c0_36, %c4] : memref<1x1x4x10x128xf32, #tpu.memory_space<vmem>>, vector<1x1x1x9x8xf32>
    %30 = vector.shape_cast %29 : vector<1x1x1x9x8xf32> to vector<9x8xf32>
    %c0_37 = arith.constant 0 : index
    %c0_38 = arith.constant 0 : index
    %c0_39 = arith.constant 0 : index
    %31 = vector.load %arg3[%c0_37, %c0_38, %c0_39] : memref<3x8x128xf32, #tpu.memory_space<vmem>>, vector<1x8x128xf32>
    %32 = vector.shape_cast %31 : vector<1x8x128xf32> to vector<8x128xf32>
    %cst_40 = arith.constant dense<0.000000e+00> : vector<9x128xf32>
    %33 = tpu.matmul %30, %32, %cst_40 {dimension_numbers = #tpu.dot_dimension_numbers<[1], [0], [0], [1], [0, 0, 1, 1], [], []>} : vector<9x8xf32>, vector<8x128xf32>, vector<9x128xf32> -> vector<9x128xf32>
    %34 = arith.addf %28, %33 : vector<9x128xf32>
    %c0_41 = arith.constant 0 : index
    %c0_42 = arith.constant 0 : index
    %c1_43 = arith.constant 1 : index
    %c0_44 = arith.constant 0 : index
    %c4_45 = arith.constant 4 : index
    %35 = vector.load %arg2[%c0_41, %c0_42, %c1_43, %c0_44, %c4_45] : memref<1x1x4x10x128xf32, #tpu.memory_space<vmem>>, vector<1x1x1x9x8xf32>
    %36 = vector.shape_cast %35 : vector<1x1x1x9x8xf32> to vector<9x8xf32>
    %c1_46 = arith.constant 1 : index
    %c0_47 = arith.constant 0 : index
    %c0_48 = arith.constant 0 : index
    %37 = vector.load %arg3[%c1_46, %c0_47, %c0_48] : memref<3x8x128xf32, #tpu.memory_space<vmem>>, vector<1x8x128xf32>
    %38 = vector.shape_cast %37 : vector<1x8x128xf32> to vector<8x128xf32>
    %cst_49 = arith.constant dense<0.000000e+00> : vector<9x128xf32>
    %39 = tpu.matmul %36, %38, %cst_49 {dimension_numbers = #tpu.dot_dimension_numbers<[1], [0], [0], [1], [0, 0, 1, 1], [], []>} : vector<9x8xf32>, vector<8x128xf32>, vector<9x128xf32> -> vector<9x128xf32>
    %40 = arith.addf %34, %39 : vector<9x128xf32>
    %c0_50 = arith.constant 0 : index
    %c0_51 = arith.constant 0 : index
    %c2_52 = arith.constant 2 : index
    %c0_53 = arith.constant 0 : index
    %c4_54 = arith.constant 4 : index
    %41 = vector.load %arg2[%c0_50, %c0_51, %c2_52, %c0_53, %c4_54] : memref<1x1x4x10x128xf32, #tpu.memory_space<vmem>>, vector<1x1x1x9x8xf32>
    %42 = vector.shape_cast %41 : vector<1x1x1x9x8xf32> to vector<9x8xf32>
    %c2_55 = arith.constant 2 : index
    %c0_56 = arith.constant 0 : index
    %c0_57 = arith.constant 0 : index
    %43 = vector.load %arg3[%c2_55, %c0_56, %c0_57] : memref<3x8x128xf32, #tpu.memory_space<vmem>>, vector<1x8x128xf32>
    %44 = vector.shape_cast %43 : vector<1x8x128xf32> to vector<8x128xf32>
    %cst_58 = arith.constant dense<0.000000e+00> : vector<9x128xf32>
    %45 = tpu.matmul %42, %44, %cst_58 {dimension_numbers = #tpu.dot_dimension_numbers<[1], [0], [0], [1], [0, 0, 1, 1], [], []>} : vector<9x8xf32>, vector<8x128xf32>, vector<9x128xf32> -> vector<9x128xf32>
    %46 = arith.addf %40, %45 : vector<9x128xf32>
    %c0_59 = arith.constant 0 : index
    %c0_60 = arith.constant 0 : index
    %47 = vector.load %arg4[%c0_59, %c0_60] : memref<1x128xf32, #tpu.memory_space<vmem>>, vector<1x128xf32>
    %48 = vector.broadcast %47 : vector<1x128xf32> to vector<9x128xf32>
    %49 = arith.addf %46, %48 : vector<9x128xf32>
    %cst_61 = arith.constant 0.000000e+00 : f32
    %50 = vector.broadcast %cst_61 : f32 to vector<9x128xf32>
    %51 = arith.maximumf %49, %50 : vector<9x128xf32>
    %52 = arith.truncf %51 : vector<9x128xf32> to vector<9x128xbf16>
    %c0_62 = arith.constant 0 : index
    %c0_63 = arith.constant 0 : index
    %c0_64 = arith.constant 0 : index
    %c9 = arith.constant 9 : index
    %c0_65 = arith.constant 0 : index
    %53 = vector.load %arg5[%c0_62, %c0_63, %c0_64, %c9, %c0_65] : memref<1x1x4x36x128xbf16, #tpu.memory_space<vmem>>, vector<1x1x1x9x128xbf16>
    %54 = vector.shape_cast %53 : vector<1x1x1x9x128xbf16> to vector<9x128xbf16>
    %55 = vector.shape_cast %52 : vector<9x128xbf16> to vector<1x1x1x9x128xbf16>
    tpu.vector_store %arg5[%c0_62, %c0_63, %c0_64, %c9, %c0_65], %55 {strides = array<i32>} : memref<1x1x4x36x128xbf16, #tpu.memory_space<vmem>>, vector<1x1x1x9x128xbf16>,
    %cst_66 = arith.constant 0.000000e+00 : f32
    %56 = vector.broadcast %cst_66 : f32 to vector<9x128xf32>
    %c0_67 = arith.constant 0 : index
    %c0_68 = arith.constant 0 : index
    %c0_69 = arith.constant 0 : index
    %c0_70 = arith.constant 0 : index
    %c8 = arith.constant 8 : index
    %57 = vector.load %arg2[%c0_67, %c0_68, %c0_69, %c0_70, %c8] : memref<1x1x4x10x128xf32, #tpu.memory_space<vmem>>, vector<1x1x1x9x8xf32>
    %58 = vector.shape_cast %57 : vector<1x1x1x9x8xf32> to vector<9x8xf32>
    %c0_71 = arith.constant 0 : index
    %c0_72 = arith.constant 0 : index
    %c0_73 = arith.constant 0 : index
    %59 = vector.load %arg3[%c0_71, %c0_72, %c0_73] : memref<3x8x128xf32, #tpu.memory_space<vmem>>, vector<1x8x128xf32>
    %60 = vector.shape_cast %59 : vector<1x8x128xf32> to vector<8x128xf32>
    %cst_74 = arith.constant dense<0.000000e+00> : vector<9x128xf32>
    %61 = tpu.matmul %58, %60, %cst_74 {dimension_numbers = #tpu.dot_dimension_numbers<[1], [0], [0], [1], [0, 0, 1, 1], [], []>} : vector<9x8xf32>, vector<8x128xf32>, vector<9x128xf32> -> vector<9x128xf32>
    %62 = arith.addf %56, %61 : vector<9x128xf32>
    %c0_75 = arith.constant 0 : index
    %c0_76 = arith.constant 0 : index
    %c1_77 = arith.constant 1 : index
    %c0_78 = arith.constant 0 : index
    %c8_79 = arith.constant 8 : index
    %63 = vector.load %arg2[%c0_75, %c0_76, %c1_77, %c0_78, %c8_79] : memref<1x1x4x10x128xf32, #tpu.memory_space<vmem>>, vector<1x1x1x9x8xf32>
    %64 = vector.shape_cast %63 : vector<1x1x1x9x8xf32> to vector<9x8xf32>
    %c1_80 = arith.constant 1 : index
    %c0_81 = arith.constant 0 : index
    %c0_82 = arith.constant 0 : index
    %65 = vector.load %arg3[%c1_80, %c0_81, %c0_82] : memref<3x8x128xf32, #tpu.memory_space<vmem>>, vector<1x8x128xf32>
    %66 = vector.shape_cast %65 : vector<1x8x128xf32> to vector<8x128xf32>
    %cst_83 = arith.constant dense<0.000000e+00> : vector<9x128xf32>
    %67 = tpu.matmul %64, %66, %cst_83 {dimension_numbers = #tpu.dot_dimension_numbers<[1], [0], [0], [1], [0, 0, 1, 1], [], []>} : vector<9x8xf32>, vector<8x128xf32>, vector<9x128xf32> -> vector<9x128xf32>
    %68 = arith.addf %62, %67 : vector<9x128xf32>
    %c0_84 = arith.constant 0 : index
    %c0_85 = arith.constant 0 : index
    %c2_86 = arith.constant 2 : index
    %c0_87 = arith.constant 0 : index
    %c8_88 = arith.constant 8 : index
    %69 = vector.load %arg2[%c0_84, %c0_85, %c2_86, %c0_87, %c8_88] : memref<1x1x4x10x128xf32, #tpu.memory_space<vmem>>, vector<1x1x1x9x8xf32>
    %70 = vector.shape_cast %69 : vector<1x1x1x9x8xf32> to vector<9x8xf32>
    %c2_89 = arith.constant 2 : index
    %c0_90 = arith.constant 0 : index
    %c0_91 = arith.constant 0 : index
    %71 = vector.load %arg3[%c2_89, %c0_90, %c0_91] : memref<3x8x128xf32, #tpu.memory_space<vmem>>, vector<1x8x128xf32>
    %72 = vector.shape_cast %71 : vector<1x8x128xf32> to vector<8x128xf32>
    %cst_92 = arith.constant dense<0.000000e+00> : vector<9x128xf32>
    %73 = tpu.matmul %70, %72, %cst_92 {dimension_numbers = #tpu.dot_dimension_numbers<[1], [0], [0], [1], [0, 0, 1, 1], [], []>} : vector<9x8xf32>, vector<8x128xf32>, vector<9x128xf32> -> vector<9x128xf32>
    %74 = arith.addf %68, %73 : vector<9x128xf32>
    %c0_93 = arith.constant 0 : index
    %c0_94 = arith.constant 0 : index
    %75 = vector.load %arg4[%c0_93, %c0_94] : memref<1x128xf32, #tpu.memory_space<vmem>>, vector<1x128xf32>
    %76 = vector.broadcast %75 : vector<1x128xf32> to vector<9x128xf32>
    %77 = arith.addf %74, %76 : vector<9x128xf32>
    %cst_95 = arith.constant 0.000000e+00 : f32
    %78 = vector.broadcast %cst_95 : f32 to vector<9x128xf32>
    %79 = arith.maximumf %77, %78 : vector<9x128xf32>
    %80 = arith.truncf %79 : vector<9x128xf32> to vector<9x128xbf16>
    %c0_96 = arith.constant 0 : index
    %c0_97 = arith.constant 0 : index
    %c0_98 = arith.constant 0 : index
    %c18 = arith.constant 18 : index
    %c0_99 = arith.constant 0 : index
    %81 = vector.load %arg5[%c0_96, %c0_97, %c0_98, %c18, %c0_99] : memref<1x1x4x36x128xbf16, #tpu.memory_space<vmem>>, vector<1x1x1x9x128xbf16>
    %82 = vector.shape_cast %81 : vector<1x1x1x9x128xbf16> to vector<9x128xbf16>
    %83 = vector.shape_cast %80 : vector<9x128xbf16> to vector<1x1x1x9x128xbf16>
    tpu.vector_store %arg5[%c0_96, %c0_97, %c0_98, %c18, %c0_99], %83 {strides = array<i32>} : memref<1x1x4x36x128xbf16, #tpu.memory_space<vmem>>, vector<1x1x1x9x128xbf16>,
    %cst_100 = arith.constant 0.000000e+00 : f32
    %84 = vector.broadcast %cst_100 : f32 to vector<9x128xf32>
    %c0_101 = arith.constant 0 : index
    %c0_102 = arith.constant 0 : index
    %c0_103 = arith.constant 0 : index
    %c0_104 = arith.constant 0 : index
    %c12 = arith.constant 12 : index
    %85 = vector.load %arg2[%c0_101, %c0_102, %c0_103, %c0_104, %c12] : memref<1x1x4x10x128xf32, #tpu.memory_space<vmem>>, vector<1x1x1x9x8xf32>
    %86 = vector.shape_cast %85 : vector<1x1x1x9x8xf32> to vector<9x8xf32>
    %c0_105 = arith.constant 0 : index
    %c0_106 = arith.constant 0 : index
    %c0_107 = arith.constant 0 : index
    %87 = vector.load %arg3[%c0_105, %c0_106, %c0_107] : memref<3x8x128xf32, #tpu.memory_space<vmem>>, vector<1x8x128xf32>
    %88 = vector.shape_cast %87 : vector<1x8x128xf32> to vector<8x128xf32>
    %cst_108 = arith.constant dense<0.000000e+00> : vector<9x128xf32>
    %89 = tpu.matmul %86, %88, %cst_108 {dimension_numbers = #tpu.dot_dimension_numbers<[1], [0], [0], [1], [0, 0, 1, 1], [], []>} : vector<9x8xf32>, vector<8x128xf32>, vector<9x128xf32> -> vector<9x128xf32>
    %90 = arith.addf %84, %89 : vector<9x128xf32>
    %c0_109 = arith.constant 0 : index
    %c0_110 = arith.constant 0 : index
    %c1_111 = arith.constant 1 : index
    %c0_112 = arith.constant 0 : index
    %c12_113 = arith.constant 12 : index
    %91 = vector.load %arg2[%c0_109, %c0_110, %c1_111, %c0_112, %c12_113] : memref<1x1x4x10x128xf32, #tpu.memory_space<vmem>>, vector<1x1x1x9x8xf32>
    %92 = vector.shape_cast %91 : vector<1x1x1x9x8xf32> to vector<9x8xf32>
    %c1_114 = arith.constant 1 : index
    %c0_115 = arith.constant 0 : index
    %c0_116 = arith.constant 0 : index
    %93 = vector.load %arg3[%c1_114, %c0_115, %c0_116] : memref<3x8x128xf32, #tpu.memory_space<vmem>>, vector<1x8x128xf32>
    %94 = vector.shape_cast %93 : vector<1x8x128xf32> to vector<8x128xf32>
    %cst_117 = arith.constant dense<0.000000e+00> : vector<9x128xf32>
    %95 = tpu.matmul %92, %94, %cst_117 {dimension_numbers = #tpu.dot_dimension_numbers<[1], [0], [0], [1], [0, 0, 1, 1], [], []>} : vector<9x8xf32>, vector<8x128xf32>, vector<9x128xf32> -> vector<9x128xf32>
    %96 = arith.addf %90, %95 : vector<9x128xf32>
    %c0_118 = arith.constant 0 : index
    %c0_119 = arith.constant 0 : index
    %c2_120 = arith.constant 2 : index
    %c0_121 = arith.constant 0 : index
    %c12_122 = arith.constant 12 : index
    %97 = vector.load %arg2[%c0_118, %c0_119, %c2_120, %c0_121, %c12_122] : memref<1x1x4x10x128xf32, #tpu.memory_space<vmem>>, vector<1x1x1x9x8xf32>
    %98 = vector.shape_cast %97 : vector<1x1x1x9x8xf32> to vector<9x8xf32>
    %c2_123 = arith.constant 2 : index
    %c0_124 = arith.constant 0 : index
    %c0_125 = arith.constant 0 : index
    %99 = vector.load %arg3[%c2_123, %c0_124, %c0_125] : memref<3x8x128xf32, #tpu.memory_space<vmem>>, vector<1x8x128xf32>
    %100 = vector.shape_cast %99 : vector<1x8x128xf32> to vector<8x128xf32>
    %cst_126 = arith.constant dense<0.000000e+00> : vector<9x128xf32>
    %101 = tpu.matmul %98, %100, %cst_126 {dimension_numbers = #tpu.dot_dimension_numbers<[1], [0], [0], [1], [0, 0, 1, 1], [], []>} : vector<9x8xf32>, vector<8x128xf32>, vector<9x128xf32> -> vector<9x128xf32>
    %102 = arith.addf %96, %101 : vector<9x128xf32>
    %c0_127 = arith.constant 0 : index
    %c0_128 = arith.constant 0 : index
    %103 = vector.load %arg4[%c0_127, %c0_128] : memref<1x128xf32, #tpu.memory_space<vmem>>, vector<1x128xf32>
    %104 = vector.broadcast %103 : vector<1x128xf32> to vector<9x128xf32>
    %105 = arith.addf %102, %104 : vector<9x128xf32>
    %cst_129 = arith.constant 0.000000e+00 : f32
    %106 = vector.broadcast %cst_129 : f32 to vector<9x128xf32>
    %107 = arith.maximumf %105, %106 : vector<9x128xf32>
    %108 = arith.truncf %107 : vector<9x128xf32> to vector<9x128xbf16>
    %c0_130 = arith.constant 0 : index
    %c0_131 = arith.constant 0 : index
    %c0_132 = arith.constant 0 : index
    %c27 = arith.constant 27 : index
    %c0_133 = arith.constant 0 : index
    %109 = vector.load %arg5[%c0_130, %c0_131, %c0_132, %c27, %c0_133] : memref<1x1x4x36x128xbf16, #tpu.memory_space<vmem>>, vector<1x1x1x9x128xbf16>
    %110 = vector.shape_cast %109 : vector<1x1x1x9x128xbf16> to vector<9x128xbf16>
    %111 = vector.shape_cast %108 : vector<9x128xbf16> to vector<1x1x1x9x128xbf16>
    tpu.vector_store %arg5[%c0_130, %c0_131, %c0_132, %c27, %c0_133], %111 {strides = array<i32>} : memref<1x1x4x36x128xbf16, #tpu.memory_space<vmem>>, vector<1x1x1x9x128xbf16>,
    %cst_134 = arith.constant 0.000000e+00 : f32
    %112 = vector.broadcast %cst_134 : f32 to vector<9x128xf32>
    %c0_135 = arith.constant 0 : index
    %c0_136 = arith.constant 0 : index
    %c0_137 = arith.constant 0 : index
    %c0_138 = arith.constant 0 : index
    %c2_139 = arith.constant 2 : index
    %113 = vector.load %arg2[%c0_135, %c0_136, %c0_137, %c0_138, %c2_139] : memref<1x1x4x10x128xf32, #tpu.memory_space<vmem>>, vector<1x1x1x9x8xf32>
    %114 = vector.shape_cast %113 : vector<1x1x1x9x8xf32> to vector<9x8xf32>
    %c0_140 = arith.constant 0 : index
    %c0_141 = arith.constant 0 : index
    %c0_142 = arith.constant 0 : index
    %115 = vector.load %arg3[%c0_140, %c0_141, %c0_142] : memref<3x8x128xf32, #tpu.memory_space<vmem>>, vector<1x8x128xf32>
    %116 = vector.shape_cast %115 : vector<1x8x128xf32> to vector<8x128xf32>
    %cst_143 = arith.constant dense<0.000000e+00> : vector<9x128xf32>
    %117 = tpu.matmul %114, %116, %cst_143 {dimension_numbers = #tpu.dot_dimension_numbers<[1], [0], [0], [1], [0, 0, 1, 1], [], []>} : vector<9x8xf32>, vector<8x128xf32>, vector<9x128xf32> -> vector<9x128xf32>
    %118 = arith.addf %112, %117 : vector<9x128xf32>
    %c0_144 = arith.constant 0 : index
    %c0_145 = arith.constant 0 : index
    %c1_146 = arith.constant 1 : index
    %c0_147 = arith.constant 0 : index
    %c2_148 = arith.constant 2 : index
    %119 = vector.load %arg2[%c0_144, %c0_145, %c1_146, %c0_147, %c2_148] : memref<1x1x4x10x128xf32, #tpu.memory_space<vmem>>, vector<1x1x1x9x8xf32>
    %120 = vector.shape_cast %119 : vector<1x1x1x9x8xf32> to vector<9x8xf32>
    %c1_149 = arith.constant 1 : index
    %c0_150 = arith.constant 0 : index
    %c0_151 = arith.constant 0 : index
    %121 = vector.load %arg3[%c1_149, %c0_150, %c0_151] : memref<3x8x128xf32, #tpu.memory_space<vmem>>, vector<1x8x128xf32>
    %122 = vector.shape_cast %121 : vector<1x8x128xf32> to vector<8x128xf32>
    %cst_152 = arith.constant dense<0.000000e+00> : vector<9x128xf32>
    %123 = tpu.matmul %120, %122, %cst_152 {dimension_numbers = #tpu.dot_dimension_numbers<[1], [0], [0], [1], [0, 0, 1, 1], [], []>} : vector<9x8xf32>, vector<8x128xf32>, vector<9x128xf32> -> vector<9x128xf32>
    %124 = arith.addf %118, %123 : vector<9x128xf32>
    %c0_153 = arith.constant 0 : index
    %c0_154 = arith.constant 0 : index
    %c2_155 = arith.constant 2 : index
    %c0_156 = arith.constant 0 : index
    %c2_157 = arith.constant 2 : index
    %125 = vector.load %arg2[%c0_153, %c0_154, %c2_155, %c0_156, %c2_157] : memref<1x1x4x10x128xf32, #tpu.memory_space<vmem>>, vector<1x1x1x9x8xf32>
    %126 = vector.shape_cast %125 : vector<1x1x1x9x8xf32> to vector<9x8xf32>
    %c2_158 = arith.constant 2 : index
    %c0_159 = arith.constant 0 : index
    %c0_160 = arith.constant 0 : index
    %127 = vector.load %arg3[%c2_158, %c0_159, %c0_160] : memref<3x8x128xf32, #tpu.memory_space<vmem>>, vector<1x8x128xf32>
    %128 = vector.shape_cast %127 : vector<1x8x128xf32> to vector<8x128xf32>
    %cst_161 = arith.constant dense<0.000000e+00> : vector<9x128xf32>
    %129 = tpu.matmul %126, %128, %cst_161 {dimension_numbers = #tpu.dot_dimension_numbers<[1], [0], [0], [1], [0, 0, 1, 1], [], []>} : vector<9x8xf32>, vector<8x128xf32>, vector<9x128xf32> -> vector<9x128xf32>
    %130 = arith.addf %124, %129 : vector<9x128xf32>
    %c0_162 = arith.constant 0 : index
    %c0_163 = arith.constant 0 : index
    %131 = vector.load %arg4[%c0_162, %c0_163] : memref<1x128xf32, #tpu.memory_space<vmem>>, vector<1x128xf32>
    %132 = vector.broadcast %131 : vector<1x128xf32> to vector<9x128xf32>
    %133 = arith.addf %130, %132 : vector<9x128xf32>
    %cst_164 = arith.constant 0.000000e+00 : f32
    %134 = vector.broadcast %cst_164 : f32 to vector<9x128xf32>
    %135 = arith.maximumf %133, %134 : vector<9x128xf32>
    %136 = arith.truncf %135 : vector<9x128xf32> to vector<9x128xbf16>
    %c0_165 = arith.constant 0 : index
    %c0_166 = arith.constant 0 : index
    %c1_167 = arith.constant 1 : index
    %c0_168 = arith.constant 0 : index
    %c0_169 = arith.constant 0 : index
    %137 = vector.load %arg5[%c0_165, %c0_166, %c1_167, %c0_168, %c0_169] : memref<1x1x4x36x128xbf16, #tpu.memory_space<vmem>>, vector<1x1x1x9x128xbf16>
    %138 = vector.shape_cast %137 : vector<1x1x1x9x128xbf16> to vector<9x128xbf16>
    %139 = vector.shape_cast %136 : vector<9x128xbf16> to vector<1x1x1x9x128xbf16>
    tpu.vector_store %arg5[%c0_165, %c0_166, %c1_167, %c0_168, %c0_169], %139 {strides = array<i32>} : memref<1x1x4x36x128xbf16, #tpu.memory_space<vmem>>, vector<1x1x1x9x128xbf16>,
    %cst_170 = arith.constant 0.000000e+00 : f32
    %140 = vector.broadcast %cst_170 : f32 to vector<9x128xf32>
    %c0_171 = arith.constant 0 : index
    %c0_172 = arith.constant 0 : index
    %c0_173 = arith.constant 0 : index
    %c0_174 = arith.constant 0 : index
    %c6 = arith.constant 6 : index
    %141 = vector.load %arg2[%c0_171, %c0_172, %c0_173, %c0_174, %c6] : memref<1x1x4x10x128xf32, #tpu.memory_space<vmem>>, vector<1x1x1x9x8xf32>
    %142 = vector.shape_cast %141 : vector<1x1x1x9x8xf32> to vector<9x8xf32>
    %c0_175 = arith.constant 0 : index
    %c0_176 = arith.constant 0 : index
    %c0_177 = arith.constant 0 : index
    %143 = vector.load %arg3[%c0_175, %c0_176, %c0_177] : memref<3x8x128xf32, #tpu.memory_space<vmem>>, vector<1x8x128xf32>
    %144 = vector.shape_cast %143 : vector<1x8x128xf32> to vector<8x128xf32>
    %cst_178 = arith.constant dense<0.000000e+00> : vector<9x128xf32>
    %145 = tpu.matmul %142, %144, %cst_178 {dimension_numbers = #tpu.dot_dimension_numbers<[1], [0], [0], [1], [0, 0, 1, 1], [], []>} : vector<9x8xf32>, vector<8x128xf32>, vector<9x128xf32> -> vector<9x128xf32>
    %146 = arith.addf %140, %145 : vector<9x128xf32>
    %c0_179 = arith.constant 0 : index
    %c0_180 = arith.constant 0 : index
    %c1_181 = arith.constant 1 : index
    %c0_182 = arith.constant 0 : index
    %c6_183 = arith.constant 6 : index
    %147 = vector.load %arg2[%c0_179, %c0_180, %c1_181, %c0_182, %c6_183] : memref<1x1x4x10x128xf32, #tpu.memory_space<vmem>>, vector<1x1x1x9x8xf32>
    %148 = vector.shape_cast %147 : vector<1x1x1x9x8xf32> to vector<9x8xf32>
    %c1_184 = arith.constant 1 : index
    %c0_185 = arith.constant 0 : index
    %c0_186 = arith.constant 0 : index
    %149 = vector.load %arg3[%c1_184, %c0_185, %c0_186] : memref<3x8x128xf32, #tpu.memory_space<vmem>>, vector<1x8x128xf32>
    %150 = vector.shape_cast %149 : vector<1x8x128xf32> to vector<8x128xf32>
    %cst_187 = arith.constant dense<0.000000e+00> : vector<9x128xf32>
    %151 = tpu.matmul %148, %150, %cst_187 {dimension_numbers = #tpu.dot_dimension_numbers<[1], [0], [0], [1], [0, 0, 1, 1], [], []>} : vector<9x8xf32>, vector<8x128xf32>, vector<9x128xf32> -> vector<9x128xf32>
    %152 = arith.addf %146, %151 : vector<9x128xf32>
    %c0_188 = arith.constant 0 : index
    %c0_189 = arith.constant 0 : index
    %c2_190 = arith.constant 2 : index
    %c0_191 = arith.constant 0 : index
    %c6_192 = arith.constant 6 : index
    %153 = vector.load %arg2[%c0_188, %c0_189, %c2_190, %c0_191, %c6_192] : memref<1x1x4x10x128xf32, #tpu.memory_space<vmem>>, vector<1x1x1x9x8xf32>
    %154 = vector.shape_cast %153 : vector<1x1x1x9x8xf32> to vector<9x8xf32>
    %c2_193 = arith.constant 2 : index
    %c0_194 = arith.constant 0 : index
    %c0_195 = arith.constant 0 : index
    %155 = vector.load %arg3[%c2_193, %c0_194, %c0_195] : memref<3x8x128xf32, #tpu.memory_space<vmem>>, vector<1x8x128xf32>
    %156 = vector.shape_cast %155 : vector<1x8x128xf32> to vector<8x128xf32>
    %cst_196 = arith.constant dense<0.000000e+00> : vector<9x128xf32>
    %157 = tpu.matmul %154, %156, %cst_196 {dimension_numbers = #tpu.dot_dimension_numbers<[1], [0], [0], [1], [0, 0, 1, 1], [], []>} : vector<9x8xf32>, vector<8x128xf32>, vector<9x128xf32> -> vector<9x128xf32>
    %158 = arith.addf %152, %157 : vector<9x128xf32>
    %c0_197 = arith.constant 0 : index
    %c0_198 = arith.constant 0 : index
    %159 = vector.load %arg4[%c0_197, %c0_198] : memref<1x128xf32, #tpu.memory_space<vmem>>, vector<1x128xf32>
    %160 = vector.broadcast %159 : vector<1x128xf32> to vector<9x128xf32>
    %161 = arith.addf %158, %160 : vector<9x128xf32>
    %cst_199 = arith.constant 0.000000e+00 : f32
    %162 = vector.broadcast %cst_199 : f32 to vector<9x128xf32>
    %163 = arith.maximumf %161, %162 : vector<9x128xf32>
    %164 = arith.truncf %163 : vector<9x128xf32> to vector<9x128xbf16>
    %c0_200 = arith.constant 0 : index
    %c0_201 = arith.constant 0 : index
    %c1_202 = arith.constant 1 : index
    %c9_203 = arith.constant 9 : index
    %c0_204 = arith.constant 0 : index
    %165 = vector.load %arg5[%c0_200, %c0_201, %c1_202, %c9_203, %c0_204] : memref<1x1x4x36x128xbf16, #tpu.memory_space<vmem>>, vector<1x1x1x9x128xbf16>
    %166 = vector.shape_cast %165 : vector<1x1x1x9x128xbf16> to vector<9x128xbf16>
    %167 = vector.shape_cast %164 : vector<9x128xbf16> to vector<1x1x1x9x128xbf16>
    tpu.vector_store %arg5[%c0_200, %c0_201, %c1_202, %c9_203, %c0_204], %167 {strides = array<i32>} : memref<1x1x4x36x128xbf16, #tpu.memory_space<vmem>>, vector<1x1x1x9x128xbf16>,
    %cst_205 = arith.constant 0.000000e+00 : f32
    %168 = vector.broadcast %cst_205 : f32 to vector<9x128xf32>
    %c0_206 = arith.constant 0 : index
    %c0_207 = arith.constant 0 : index
    %c0_208 = arith.constant 0 : index
    %c0_209 = arith.constant 0 : index
    %c10 = arith.constant 10 : index
    %169 = vector.load %arg2[%c0_206, %c0_207, %c0_208, %c0_209, %c10] : memref<1x1x4x10x128xf32, #tpu.memory_space<vmem>>, vector<1x1x1x9x8xf32>
    %170 = vector.shape_cast %169 : vector<1x1x1x9x8xf32> to vector<9x8xf32>
    %c0_210 = arith.constant 0 : index
    %c0_211 = arith.constant 0 : index
    %c0_212 = arith.constant 0 : index
    %171 = vector.load %arg3[%c0_210, %c0_211, %c0_212] : memref<3x8x128xf32, #tpu.memory_space<vmem>>, vector<1x8x128xf32>
    %172 = vector.shape_cast %171 : vector<1x8x128xf32> to vector<8x128xf32>
    %cst_213 = arith.constant dense<0.000000e+00> : vector<9x128xf32>
    %173 = tpu.matmul %170, %172, %cst_213 {dimension_numbers = #tpu.dot_dimension_numbers<[1], [0], [0], [1], [0, 0, 1, 1], [], []>} : vector<9x8xf32>, vector<8x128xf32>, vector<9x128xf32> -> vector<9x128xf32>
    %174 = arith.addf %168, %173 : vector<9x128xf32>
    %c0_214 = arith.constant 0 : index
    %c0_215 = arith.constant 0 : index
    %c1_216 = arith.constant 1 : index
    %c0_217 = arith.constant 0 : index
    %c10_218 = arith.constant 10 : index
    %175 = vector.load %arg2[%c0_214, %c0_215, %c1_216, %c0_217, %c10_218] : memref<1x1x4x10x128xf32, #tpu.memory_space<vmem>>, vector<1x1x1x9x8xf32>
    %176 = vector.shape_cast %175 : vector<1x1x1x9x8xf32> to vector<9x8xf32>
    %c1_219 = arith.constant 1 : index
    %c0_220 = arith.constant 0 : index
    %c0_221 = arith.constant 0 : index
    %177 = vector.load %arg3[%c1_219, %c0_220, %c0_221] : memref<3x8x128xf32, #tpu.memory_space<vmem>>, vector<1x8x128xf32>
    %178 = vector.shape_cast %177 : vector<1x8x128xf32> to vector<8x128xf32>
    %cst_222 = arith.constant dense<0.000000e+00> : vector<9x128xf32>
    %179 = tpu.matmul %176, %178, %cst_222 {dimension_numbers = #tpu.dot_dimension_numbers<[1], [0], [0], [1], [0, 0, 1, 1], [], []>} : vector<9x8xf32>, vector<8x128xf32>, vector<9x128xf32> -> vector<9x128xf32>
    %180 = arith.addf %174, %179 : vector<9x128xf32>
    %c0_223 = arith.constant 0 : index
    %c0_224 = arith.constant 0 : index
    %c2_225 = arith.constant 2 : index
    %c0_226 = arith.constant 0 : index
    %c10_227 = arith.constant 10 : index
    %181 = vector.load %arg2[%c0_223, %c0_224, %c2_225, %c0_226, %c10_227] : memref<1x1x4x10x128xf32, #tpu.memory_space<vmem>>, vector<1x1x1x9x8xf32>
    %182 = vector.shape_cast %181 : vector<1x1x1x9x8xf32> to vector<9x8xf32>
    %c2_228 = arith.constant 2 : index
    %c0_229 = arith.constant 0 : index
    %c0_230 = arith.constant 0 : index
    %183 = vector.load %arg3[%c2_228, %c0_229, %c0_230] : memref<3x8x128xf32, #tpu.memory_space<vmem>>, vector<1x8x128xf32>
    %184 = vector.shape_cast %183 : vector<1x8x128xf32> to vector<8x128xf32>
    %cst_231 = arith.constant dense<0.000000e+00> : vector<9x128xf32>
    %185 = tpu.matmul %182, %184, %cst_231 {dimension_numbers = #tpu.dot_dimension_numbers<[1], [0], [0], [1], [0, 0, 1, 1], [], []>} : vector<9x8xf32>, vector<8x128xf32>, vector<9x128xf32> -> vector<9x128xf32>
    %186 = arith.addf %180, %185 : vector<9x128xf32>
    %c0_232 = arith.constant 0 : index
    %c0_233 = arith.constant 0 : index
    %187 = vector.load %arg4[%c0_232, %c0_233] : memref<1x128xf32, #tpu.memory_space<vmem>>, vector<1x128xf32>
    %188 = vector.broadcast %187 : vector<1x128xf32> to vector<9x128xf32>
    %189 = arith.addf %186, %188 : vector<9x128xf32>
    %cst_234 = arith.constant 0.000000e+00 : f32
    %190 = vector.broadcast %cst_234 : f32 to vector<9x128xf32>
    %191 = arith.maximumf %189, %190 : vector<9x128xf32>
    %192 = arith.truncf %191 : vector<9x128xf32> to vector<9x128xbf16>
    %c0_235 = arith.constant 0 : index
    %c0_236 = arith.constant 0 : index
    %c1_237 = arith.constant 1 : index
    %c18_238 = arith.constant 18 : index
    %c0_239 = arith.constant 0 : index
    %193 = vector.load %arg5[%c0_235, %c0_236, %c1_237, %c18_238, %c0_239] : memref<1x1x4x36x128xbf16, #tpu.memory_space<vmem>>, vector<1x1x1x9x128xbf16>
    %194 = vector.shape_cast %193 : vector<1x1x1x9x128xbf16> to vector<9x128xbf16>
    %195 = vector.shape_cast %192 : vector<9x128xbf16> to vector<1x1x1x9x128xbf16>
    tpu.vector_store %arg5[%c0_235, %c0_236, %c1_237, %c18_238, %c0_239], %195 {strides = array<i32>} : memref<1x1x4x36x128xbf16, #tpu.memory_space<vmem>>, vector<1x1x1x9x128xbf16>,
    %cst_240 = arith.constant 0.000000e+00 : f32
    %196 = vector.broadcast %cst_240 : f32 to vector<9x128xf32>
    %c0_241 = arith.constant 0 : index
    %c0_242 = arith.constant 0 : index
    %c0_243 = arith.constant 0 : index
    %c0_244 = arith.constant 0 : index
    %c14 = arith.constant 14 : index
    %197 = vector.load %arg2[%c0_241, %c0_242, %c0_243, %c0_244, %c14] : memref<1x1x4x10x128xf32, #tpu.memory_space<vmem>>, vector<1x1x1x9x8xf32>
    %198 = vector.shape_cast %197 : vector<1x1x1x9x8xf32> to vector<9x8xf32>
    %c0_245 = arith.constant 0 : index
    %c0_246 = arith.constant 0 : index
    %c0_247 = arith.constant 0 : index
    %199 = vector.load %arg3[%c0_245, %c0_246, %c0_247] : memref<3x8x128xf32, #tpu.memory_space<vmem>>, vector<1x8x128xf32>
    %200 = vector.shape_cast %199 : vector<1x8x128xf32> to vector<8x128xf32>
    %cst_248 = arith.constant dense<0.000000e+00> : vector<9x128xf32>
    %201 = tpu.matmul %198, %200, %cst_248 {dimension_numbers = #tpu.dot_dimension_numbers<[1], [0], [0], [1], [0, 0, 1, 1], [], []>} : vector<9x8xf32>, vector<8x128xf32>, vector<9x128xf32> -> vector<9x128xf32>
    %202 = arith.addf %196, %201 : vector<9x128xf32>
    %c0_249 = arith.constant 0 : index
    %c0_250 = arith.constant 0 : index
    %c1_251 = arith.constant 1 : index
    %c0_252 = arith.constant 0 : index
    %c14_253 = arith.constant 14 : index
    %203 = vector.load %arg2[%c0_249, %c0_250, %c1_251, %c0_252, %c14_253] : memref<1x1x4x10x128xf32, #tpu.memory_space<vmem>>, vector<1x1x1x9x8xf32>
    %204 = vector.shape_cast %203 : vector<1x1x1x9x8xf32> to vector<9x8xf32>
    %c1_254 = arith.constant 1 : index
    %c0_255 = arith.constant 0 : index
    %c0_256 = arith.constant 0 : index
    %205 = vector.load %arg3[%c1_254, %c0_255, %c0_256] : memref<3x8x128xf32, #tpu.memory_space<vmem>>, vector<1x8x128xf32>
    %206 = vector.shape_cast %205 : vector<1x8x128xf32> to vector<8x128xf32>
    %cst_257 = arith.constant dense<0.000000e+00> : vector<9x128xf32>
    %207 = tpu.matmul %204, %206, %cst_257 {dimension_numbers = #tpu.dot_dimension_numbers<[1], [0], [0], [1], [0, 0, 1, 1], [], []>} : vector<9x8xf32>, vector<8x128xf32>, vector<9x128xf32> -> vector<9x128xf32>
    %208 = arith.addf %202, %207 : vector<9x128xf32>
    %c0_258 = arith.constant 0 : index
    %c0_259 = arith.constant 0 : index
    %c2_260 = arith.constant 2 : index
    %c0_261 = arith.constant 0 : index
    %c14_262 = arith.constant 14 : index
    %209 = vector.load %arg2[%c0_258, %c0_259, %c2_260, %c0_261, %c14_262] : memref<1x1x4x10x128xf32, #tpu.memory_space<vmem>>, vector<1x1x1x9x8xf32>
    %210 = vector.shape_cast %209 : vector<1x1x1x9x8xf32> to vector<9x8xf32>
    %c2_263 = arith.constant 2 : index
    %c0_264 = arith.constant 0 : index
    %c0_265 = arith.constant 0 : index
    %211 = vector.load %arg3[%c2_263, %c0_264, %c0_265] : memref<3x8x128xf32, #tpu.memory_space<vmem>>, vector<1x8x128xf32>
    %212 = vector.shape_cast %211 : vector<1x8x128xf32> to vector<8x128xf32>
    %cst_266 = arith.constant dense<0.000000e+00> : vector<9x128xf32>
    %213 = tpu.matmul %210, %212, %cst_266 {dimension_numbers = #tpu.dot_dimension_numbers<[1], [0], [0], [1], [0, 0, 1, 1], [], []>} : vector<9x8xf32>, vector<8x128xf32>, vector<9x128xf32> -> vector<9x128xf32>
    %214 = arith.addf %208, %213 : vector<9x128xf32>
    %c0_267 = arith.constant 0 : index
    %c0_268 = arith.constant 0 : index
    %215 = vector.load %arg4[%c0_267, %c0_268] : memref<1x128xf32, #tpu.memory_space<vmem>>, vector<1x128xf32>
    %216 = vector.broadcast %215 : vector<1x128xf32> to vector<9x128xf32>
    %217 = arith.addf %214, %216 : vector<9x128xf32>
    %cst_269 = arith.constant 0.000000e+00 : f32
    %218 = vector.broadcast %cst_269 : f32 to vector<9x128xf32>
    %219 = arith.maximumf %217, %218 : vector<9x128xf32>
    %220 = arith.truncf %219 : vector<9x128xf32> to vector<9x128xbf16>
    %c0_270 = arith.constant 0 : index
    %c0_271 = arith.constant 0 : index
    %c1_272 = arith.constant 1 : index
    %c27_273 = arith.constant 27 : index
    %c0_274 = arith.constant 0 : index
    %221 = vector.load %arg5[%c0_270, %c0_271, %c1_272, %c27_273, %c0_274] : memref<1x1x4x36x128xbf16, #tpu.memory_space<vmem>>, vector<1x1x1x9x128xbf16>
    %222 = vector.shape_cast %221 : vector<1x1x1x9x128xbf16> to vector<9x128xbf16>
    %223 = vector.shape_cast %220 : vector<9x128xbf16> to vector<1x1x1x9x128xbf16>
    tpu.vector_store %arg5[%c0_270, %c0_271, %c1_272, %c27_273, %c0_274], %223 {strides = array<i32>} : memref<1x1x4x36x128xbf16, #tpu.memory_space<vmem>>, vector<1x1x1x9x128xbf16>,
    %cst_275 = arith.constant 0.000000e+00 : f32
    %224 = vector.broadcast %cst_275 : f32 to vector<9x128xf32>
    %c0_276 = arith.constant 0 : index
    %c0_277 = arith.constant 0 : index
    %c2_278 = arith.constant 2 : index
    %c0_279 = arith.constant 0 : index
    %c0_280 = arith.constant 0 : index
    %225 = vector.load %arg2[%c0_276, %c0_277, %c2_278, %c0_279, %c0_280] : memref<1x1x4x10x128xf32, #tpu.memory_space<vmem>>, vector<1x1x1x9x8xf32>
    %226 = vector.shape_cast %225 : vector<1x1x1x9x8xf32> to vector<9x8xf32>
    %c0_281 = arith.constant 0 : index
    %c0_282 = arith.constant 0 : index
    %c0_283 = arith.constant 0 : index
    %227 = vector.load %arg3[%c0_281, %c0_282, %c0_283] : memref<3x8x128xf32, #tpu.memory_space<vmem>>, vector<1x8x128xf32>
    %228 = vector.shape_cast %227 : vector<1x8x128xf32> to vector<8x128xf32>
    %cst_284 = arith.constant dense<0.000000e+00> : vector<9x128xf32>
    %229 = tpu.matmul %226, %228, %cst_284 {dimension_numbers = #tpu.dot_dimension_numbers<[1], [0], [0], [1], [0, 0, 1, 1], [], []>} : vector<9x8xf32>, vector<8x128xf32>, vector<9x128xf32> -> vector<9x128xf32>
    %230 = arith.addf %224, %229 : vector<9x128xf32>
    %c0_285 = arith.constant 0 : index
    %c0_286 = arith.constant 0 : index
    %c3 = arith.constant 3 : index
    %c0_287 = arith.constant 0 : index
    %c0_288 = arith.constant 0 : index
    %231 = vector.load %arg2[%c0_285, %c0_286, %c3, %c0_287, %c0_288] : memref<1x1x4x10x128xf32, #tpu.memory_space<vmem>>, vector<1x1x1x9x8xf32>
    %232 = vector.shape_cast %231 : vector<1x1x1x9x8xf32> to vector<9x8xf32>
    %c1_289 = arith.constant 1 : index
    %c0_290 = arith.constant 0 : index
    %c0_291 = arith.constant 0 : index
    %233 = vector.load %arg3[%c1_289, %c0_290, %c0_291] : memref<3x8x128xf32, #tpu.memory_space<vmem>>, vector<1x8x128xf32>
    %234 = vector.shape_cast %233 : vector<1x8x128xf32> to vector<8x128xf32>
    %cst_292 = arith.constant dense<0.000000e+00> : vector<9x128xf32>
    %235 = tpu.matmul %232, %234, %cst_292 {dimension_numbers = #tpu.dot_dimension_numbers<[1], [0], [0], [1], [0, 0, 1, 1], [], []>} : vector<9x8xf32>, vector<8x128xf32>, vector<9x128xf32> -> vector<9x128xf32>
    %236 = arith.addf %230, %235 : vector<9x128xf32>
    %c0_293 = arith.constant 0 : index
    %c0_294 = arith.constant 0 : index
    %c0_295 = arith.constant 0 : index
    %c1_296 = arith.constant 1 : index
    %c0_297 = arith.constant 0 : index
    %237 = vector.load %arg2[%c0_293, %c0_294, %c0_295, %c1_296, %c0_297] : memref<1x1x4x10x128xf32, #tpu.memory_space<vmem>>, vector<1x1x1x9x8xf32>
    %238 = vector.shape_cast %237 : vector<1x1x1x9x8xf32> to vector<9x8xf32>
    %c2_298 = arith.constant 2 : index
    %c0_299 = arith.constant 0 : index
    %c0_300 = arith.constant 0 : index
    %239 = vector.load %arg3[%c2_298, %c0_299, %c0_300] : memref<3x8x128xf32, #tpu.memory_space<vmem>>, vector<1x8x128xf32>
    %240 = vector.shape_cast %239 : vector<1x8x128xf32> to vector<8x128xf32>
    %cst_301 = arith.constant dense<0.000000e+00> : vector<9x128xf32>
    %241 = tpu.matmul %238, %240, %cst_301 {dimension_numbers = #tpu.dot_dimension_numbers<[1], [0], [0], [1], [0, 0, 1, 1], [], []>} : vector<9x8xf32>, vector<8x128xf32>, vector<9x128xf32> -> vector<9x128xf32>
    %242 = arith.addf %236, %241 : vector<9x128xf32>
    %c0_302 = arith.constant 0 : index
    %c0_303 = arith.constant 0 : index
    %243 = vector.load %arg4[%c0_302, %c0_303] : memref<1x128xf32, #tpu.memory_space<vmem>>, vector<1x128xf32>
    %244 = vector.broadcast %243 : vector<1x128xf32> to vector<9x128xf32>
    %245 = arith.addf %242, %244 : vector<9x128xf32>
    %cst_304 = arith.constant 0.000000e+00 : f32
    %246 = vector.broadcast %cst_304 : f32 to vector<9x128xf32>
    %247 = arith.maximumf %245, %246 : vector<9x128xf32>
    %248 = arith.truncf %247 : vector<9x128xf32> to vector<9x128xbf16>
    %c0_305 = arith.constant 0 : index
    %c0_306 = arith.constant 0 : index
    %c2_307 = arith.constant 2 : index
    %c0_308 = arith.constant 0 : index
    %c0_309 = arith.constant 0 : index
    %249 = vector.load %arg5[%c0_305, %c0_306, %c2_307, %c0_308, %c0_309] : memref<1x1x4x36x128xbf16, #tpu.memory_space<vmem>>, vector<1x1x1x9x128xbf16>
    %250 = vector.shape_cast %249 : vector<1x1x1x9x128xbf16> to vector<9x128xbf16>
    %251 = vector.shape_cast %248 : vector<9x128xbf16> to vector<1x1x1x9x128xbf16>
    tpu.vector_store %arg5[%c0_305, %c0_306, %c2_307, %c0_308, %c0_309], %251 {strides = array<i32>} : memref<1x1x4x36x128xbf16, #tpu.memory_space<vmem>>, vector<1x1x1x9x128xbf16>,
    %cst_310 = arith.constant 0.000000e+00 : f32
    %252 = vector.broadcast %cst_310 : f32 to vector<9x128xf32>
    %c0_311 = arith.constant 0 : index
    %c0_312 = arith.constant 0 : index
    %c2_313 = arith.constant 2 : index
    %c0_314 = arith.constant 0 : index
    %c4_315 = arith.constant 4 : index
    %253 = vector.load %arg2[%c0_311, %c0_312, %c2_313, %c0_314, %c4_315] : memref<1x1x4x10x128xf32, #tpu.memory_space<vmem>>, vector<1x1x1x9x8xf32>
    %254 = vector.shape_cast %253 : vector<1x1x1x9x8xf32> to vector<9x8xf32>
    %c0_316 = arith.constant 0 : index
    %c0_317 = arith.constant 0 : index
    %c0_318 = arith.constant 0 : index
    %255 = vector.load %arg3[%c0_316, %c0_317, %c0_318] : memref<3x8x128xf32, #tpu.memory_space<vmem>>, vector<1x8x128xf32>
    %256 = vector.shape_cast %255 : vector<1x8x128xf32> to vector<8x128xf32>
    %cst_319 = arith.constant dense<0.000000e+00> : vector<9x128xf32>
    %257 = tpu.matmul %254, %256, %cst_319 {dimension_numbers = #tpu.dot_dimension_numbers<[1], [0], [0], [1], [0, 0, 1, 1], [], []>} : vector<9x8xf32>, vector<8x128xf32>, vector<9x128xf32> -> vector<9x128xf32>
    %258 = arith.addf %252, %257 : vector<9x128xf32>
    %c0_320 = arith.constant 0 : index
    %c0_321 = arith.constant 0 : index
    %c3_322 = arith.constant 3 : index
    %c0_323 = arith.constant 0 : index
    %c4_324 = arith.constant 4 : index
    %259 = vector.load %arg2[%c0_320, %c0_321, %c3_322, %c0_323, %c4_324] : memref<1x1x4x10x128xf32, #tpu.memory_space<vmem>>, vector<1x1x1x9x8xf32>
    %260 = vector.shape_cast %259 : vector<1x1x1x9x8xf32> to vector<9x8xf32>
    %c1_325 = arith.constant 1 : index
    %c0_326 = arith.constant 0 : index
    %c0_327 = arith.constant 0 : index
    %261 = vector.load %arg3[%c1_325, %c0_326, %c0_327] : memref<3x8x128xf32, #tpu.memory_space<vmem>>, vector<1x8x128xf32>
    %262 = vector.shape_cast %261 : vector<1x8x128xf32> to vector<8x128xf32>
    %cst_328 = arith.constant dense<0.000000e+00> : vector<9x128xf32>
    %263 = tpu.matmul %260, %262, %cst_328 {dimension_numbers = #tpu.dot_dimension_numbers<[1], [0], [0], [1], [0, 0, 1, 1], [], []>} : vector<9x8xf32>, vector<8x128xf32>, vector<9x128xf32> -> vector<9x128xf32>
    %264 = arith.addf %258, %263 : vector<9x128xf32>
    %c0_329 = arith.constant 0 : index
    %c0_330 = arith.constant 0 : index
    %c0_331 = arith.constant 0 : index
    %c1_332 = arith.constant 1 : index
    %c4_333 = arith.constant 4 : index
    %265 = vector.load %arg2[%c0_329, %c0_330, %c0_331, %c1_332, %c4_333] : memref<1x1x4x10x128xf32, #tpu.memory_space<vmem>>, vector<1x1x1x9x8xf32>
    %266 = vector.shape_cast %265 : vector<1x1x1x9x8xf32> to vector<9x8xf32>
    %c2_334 = arith.constant 2 : index
    %c0_335 = arith.constant 0 : index
    %c0_336 = arith.constant 0 : index
    %267 = vector.load %arg3[%c2_334, %c0_335, %c0_336] : memref<3x8x128xf32, #tpu.memory_space<vmem>>, vector<1x8x128xf32>
    %268 = vector.shape_cast %267 : vector<1x8x128xf32> to vector<8x128xf32>
    %cst_337 = arith.constant dense<0.000000e+00> : vector<9x128xf32>
    %269 = tpu.matmul %266, %268, %cst_337 {dimension_numbers = #tpu.dot_dimension_numbers<[1], [0], [0], [1], [0, 0, 1, 1], [], []>} : vector<9x8xf32>, vector<8x128xf32>, vector<9x128xf32> -> vector<9x128xf32>
    %270 = arith.addf %264, %269 : vector<9x128xf32>
    %c0_338 = arith.constant 0 : index
    %c0_339 = arith.constant 0 : index
    %271 = vector.load %arg4[%c0_338, %c0_339] : memref<1x128xf32, #tpu.memory_space<vmem>>, vector<1x128xf32>
    %272 = vector.broadcast %271 : vector<1x128xf32> to vector<9x128xf32>
    %273 = arith.addf %270, %272 : vector<9x128xf32>
    %cst_340 = arith.constant 0.000000e+00 : f32
    %274 = vector.broadcast %cst_340 : f32 to vector<9x128xf32>
    %275 = arith.maximumf %273, %274 : vector<9x128xf32>
    %276 = arith.truncf %275 : vector<9x128xf32> to vector<9x128xbf16>
    %c0_341 = arith.constant 0 : index
    %c0_342 = arith.constant 0 : index
    %c2_343 = arith.constant 2 : index
    %c9_344 = arith.constant 9 : index
    %c0_345 = arith.constant 0 : index
    %277 = vector.load %arg5[%c0_341, %c0_342, %c2_343, %c9_344, %c0_345] : memref<1x1x4x36x128xbf16, #tpu.memory_space<vmem>>, vector<1x1x1x9x128xbf16>
    %278 = vector.shape_cast %277 : vector<1x1x1x9x128xbf16> to vector<9x128xbf16>
    %279 = vector.shape_cast %276 : vector<9x128xbf16> to vector<1x1x1x9x128xbf16>
    tpu.vector_store %arg5[%c0_341, %c0_342, %c2_343, %c9_344, %c0_345], %279 {strides = array<i32>} : memref<1x1x4x36x128xbf16, #tpu.memory_space<vmem>>, vector<1x1x1x9x128xbf16>,
    %cst_346 = arith.constant 0.000000e+00 : f32
    %280 = vector.broadcast %cst_346 : f32 to vector<9x128xf32>
    %c0_347 = arith.constant 0 : index
    %c0_348 = arith.constant 0 : index
    %c2_349 = arith.constant 2 : index
    %c0_350 = arith.constant 0 : index
    %c8_351 = arith.constant 8 : index
    %281 = vector.load %arg2[%c0_347, %c0_348, %c2_349, %c0_350, %c8_351] : memref<1x1x4x10x128xf32, #tpu.memory_space<vmem>>, vector<1x1x1x9x8xf32>
    %282 = vector.shape_cast %281 : vector<1x1x1x9x8xf32> to vector<9x8xf32>
    %c0_352 = arith.constant 0 : index
    %c0_353 = arith.constant 0 : index
    %c0_354 = arith.constant 0 : index
    %283 = vector.load %arg3[%c0_352, %c0_353, %c0_354] : memref<3x8x128xf32, #tpu.memory_space<vmem>>, vector<1x8x128xf32>
    %284 = vector.shape_cast %283 : vector<1x8x128xf32> to vector<8x128xf32>
    %cst_355 = arith.constant dense<0.000000e+00> : vector<9x128xf32>
    %285 = tpu.matmul %282, %284, %cst_355 {dimension_numbers = #tpu.dot_dimension_numbers<[1], [0], [0], [1], [0, 0, 1, 1], [], []>} : vector<9x8xf32>, vector<8x128xf32>, vector<9x128xf32> -> vector<9x128xf32>
    %286 = arith.addf %280, %285 : vector<9x128xf32>
    %c0_356 = arith.constant 0 : index
    %c0_357 = arith.constant 0 : index
    %c3_358 = arith.constant 3 : index
    %c0_359 = arith.constant 0 : index
    %c8_360 = arith.constant 8 : index
    %287 = vector.load %arg2[%c0_356, %c0_357, %c3_358, %c0_359, %c8_360] : memref<1x1x4x10x128xf32, #tpu.memory_space<vmem>>, vector<1x1x1x9x8xf32>
    %288 = vector.shape_cast %287 : vector<1x1x1x9x8xf32> to vector<9x8xf32>
    %c1_361 = arith.constant 1 : index
    %c0_362 = arith.constant 0 : index
    %c0_363 = arith.constant 0 : index
    %289 = vector.load %arg3[%c1_361, %c0_362, %c0_363] : memref<3x8x128xf32, #tpu.memory_space<vmem>>, vector<1x8x128xf32>
    %290 = vector.shape_cast %289 : vector<1x8x128xf32> to vector<8x128xf32>
    %cst_364 = arith.constant dense<0.000000e+00> : vector<9x128xf32>
    %291 = tpu.matmul %288, %290, %cst_364 {dimension_numbers = #tpu.dot_dimension_numbers<[1], [0], [0], [1], [0, 0, 1, 1], [], []>} : vector<9x8xf32>, vector<8x128xf32>, vector<9x128xf32> -> vector<9x128xf32>
    %292 = arith.addf %286, %291 : vector<9x128xf32>
    %c0_365 = arith.constant 0 : index
    %c0_366 = arith.constant 0 : index
    %c0_367 = arith.constant 0 : index
    %c1_368 = arith.constant 1 : index
    %c8_369 = arith.constant 8 : index
    %293 = vector.load %arg2[%c0_365, %c0_366, %c0_367, %c1_368, %c8_369] : memref<1x1x4x10x128xf32, #tpu.memory_space<vmem>>, vector<1x1x1x9x8xf32>
    %294 = vector.shape_cast %293 : vector<1x1x1x9x8xf32> to vector<9x8xf32>
    %c2_370 = arith.constant 2 : index
    %c0_371 = arith.constant 0 : index
    %c0_372 = arith.constant 0 : index
    %295 = vector.load %arg3[%c2_370, %c0_371, %c0_372] : memref<3x8x128xf32, #tpu.memory_space<vmem>>, vector<1x8x128xf32>
    %296 = vector.shape_cast %295 : vector<1x8x128xf32> to vector<8x128xf32>
    %cst_373 = arith.constant dense<0.000000e+00> : vector<9x128xf32>
    %297 = tpu.matmul %294, %296, %cst_373 {dimension_numbers = #tpu.dot_dimension_numbers<[1], [0], [0], [1], [0, 0, 1, 1], [], []>} : vector<9x8xf32>, vector<8x128xf32>, vector<9x128xf32> -> vector<9x128xf32>
    %298 = arith.addf %292, %297 : vector<9x128xf32>
    %c0_374 = arith.constant 0 : index
    %c0_375 = arith.constant 0 : index
    %299 = vector.load %arg4[%c0_374, %c0_375] : memref<1x128xf32, #tpu.memory_space<vmem>>, vector<1x128xf32>
    %300 = vector.broadcast %299 : vector<1x128xf32> to vector<9x128xf32>
    %301 = arith.addf %298, %300 : vector<9x128xf32>
    %cst_376 = arith.constant 0.000000e+00 : f32
    %302 = vector.broadcast %cst_376 : f32 to vector<9x128xf32>
    %303 = arith.maximumf %301, %302 : vector<9x128xf32>
    %304 = arith.truncf %303 : vector<9x128xf32> to vector<9x128xbf16>
    %c0_377 = arith.constant 0 : index
    %c0_378 = arith.constant 0 : index
    %c2_379 = arith.constant 2 : index
    %c18_380 = arith.constant 18 : index
    %c0_381 = arith.constant 0 : index
    %305 = vector.load %arg5[%c0_377, %c0_378, %c2_379, %c18_380, %c0_381] : memref<1x1x4x36x128xbf16, #tpu.memory_space<vmem>>, vector<1x1x1x9x128xbf16>
    %306 = vector.shape_cast %305 : vector<1x1x1x9x128xbf16> to vector<9x128xbf16>
    %307 = vector.shape_cast %304 : vector<9x128xbf16> to vector<1x1x1x9x128xbf16>
    tpu.vector_store %arg5[%c0_377, %c0_378, %c2_379, %c18_380, %c0_381], %307 {strides = array<i32>} : memref<1x1x4x36x128xbf16, #tpu.memory_space<vmem>>, vector<1x1x1x9x128xbf16>,
    %cst_382 = arith.constant 0.000000e+00 : f32
    %308 = vector.broadcast %cst_382 : f32 to vector<9x128xf32>
    %c0_383 = arith.constant 0 : index
    %c0_384 = arith.constant 0 : index
    %c2_385 = arith.constant 2 : index
    %c0_386 = arith.constant 0 : index
    %c12_387 = arith.constant 12 : index
    %309 = vector.load %arg2[%c0_383, %c0_384, %c2_385, %c0_386, %c12_387] : memref<1x1x4x10x128xf32, #tpu.memory_space<vmem>>, vector<1x1x1x9x8xf32>
    %310 = vector.shape_cast %309 : vector<1x1x1x9x8xf32> to vector<9x8xf32>
    %c0_388 = arith.constant 0 : index
    %c0_389 = arith.constant 0 : index
    %c0_390 = arith.constant 0 : index
    %311 = vector.load %arg3[%c0_388, %c0_389, %c0_390] : memref<3x8x128xf32, #tpu.memory_space<vmem>>, vector<1x8x128xf32>
    %312 = vector.shape_cast %311 : vector<1x8x128xf32> to vector<8x128xf32>
    %cst_391 = arith.constant dense<0.000000e+00> : vector<9x128xf32>
    %313 = tpu.matmul %310, %312, %cst_391 {dimension_numbers = #tpu.dot_dimension_numbers<[1], [0], [0], [1], [0, 0, 1, 1], [], []>} : vector<9x8xf32>, vector<8x128xf32>, vector<9x128xf32> -> vector<9x128xf32>
    %314 = arith.addf %308, %313 : vector<9x128xf32>
    %c0_392 = arith.constant 0 : index
    %c0_393 = arith.constant 0 : index
    %c3_394 = arith.constant 3 : index
    %c0_395 = arith.constant 0 : index
    %c12_396 = arith.constant 12 : index
    %315 = vector.load %arg2[%c0_392, %c0_393, %c3_394, %c0_395, %c12_396] : memref<1x1x4x10x128xf32, #tpu.memory_space<vmem>>, vector<1x1x1x9x8xf32>
    %316 = vector.shape_cast %315 : vector<1x1x1x9x8xf32> to vector<9x8xf32>
    %c1_397 = arith.constant 1 : index
    %c0_398 = arith.constant 0 : index
    %c0_399 = arith.constant 0 : index
    %317 = vector.load %arg3[%c1_397, %c0_398, %c0_399] : memref<3x8x128xf32, #tpu.memory_space<vmem>>, vector<1x8x128xf32>
    %318 = vector.shape_cast %317 : vector<1x8x128xf32> to vector<8x128xf32>
    %cst_400 = arith.constant dense<0.000000e+00> : vector<9x128xf32>
    %319 = tpu.matmul %316, %318, %cst_400 {dimension_numbers = #tpu.dot_dimension_numbers<[1], [0], [0], [1], [0, 0, 1, 1], [], []>} : vector<9x8xf32>, vector<8x128xf32>, vector<9x128xf32> -> vector<9x128xf32>
    %320 = arith.addf %314, %319 : vector<9x128xf32>
    %c0_401 = arith.constant 0 : index
    %c0_402 = arith.constant 0 : index
    %c0_403 = arith.constant 0 : index
    %c1_404 = arith.constant 1 : index
    %c12_405 = arith.constant 12 : index
    %321 = vector.load %arg2[%c0_401, %c0_402, %c0_403, %c1_404, %c12_405] : memref<1x1x4x10x128xf32, #tpu.memory_space<vmem>>, vector<1x1x1x9x8xf32>
    %322 = vector.shape_cast %321 : vector<1x1x1x9x8xf32> to vector<9x8xf32>
    %c2_406 = arith.constant 2 : index
    %c0_407 = arith.constant 0 : index
    %c0_408 = arith.constant 0 : index
    %323 = vector.load %arg3[%c2_406, %c0_407, %c0_408] : memref<3x8x128xf32, #tpu.memory_space<vmem>>, vector<1x8x128xf32>
    %324 = vector.shape_cast %323 : vector<1x8x128xf32> to vector<8x128xf32>
    %cst_409 = arith.constant dense<0.000000e+00> : vector<9x128xf32>
    %325 = tpu.matmul %322, %324, %cst_409 {dimension_numbers = #tpu.dot_dimension_numbers<[1], [0], [0], [1], [0, 0, 1, 1], [], []>} : vector<9x8xf32>, vector<8x128xf32>, vector<9x128xf32> -> vector<9x128xf32>
    %326 = arith.addf %320, %325 : vector<9x128xf32>
    %c0_410 = arith.constant 0 : index
    %c0_411 = arith.constant 0 : index
    %327 = vector.load %arg4[%c0_410, %c0_411] : memref<1x128xf32, #tpu.memory_space<vmem>>, vector<1x128xf32>
    %328 = vector.broadcast %327 : vector<1x128xf32> to vector<9x128xf32>
    %329 = arith.addf %326, %328 : vector<9x128xf32>
    %cst_412 = arith.constant 0.000000e+00 : f32
    %330 = vector.broadcast %cst_412 : f32 to vector<9x128xf32>
    %331 = arith.maximumf %329, %330 : vector<9x128xf32>
    %332 = arith.truncf %331 : vector<9x128xf32> to vector<9x128xbf16>
    %c0_413 = arith.constant 0 : index
    %c0_414 = arith.constant 0 : index
    %c2_415 = arith.constant 2 : index
    %c27_416 = arith.constant 27 : index
    %c0_417 = arith.constant 0 : index
    %333 = vector.load %arg5[%c0_413, %c0_414, %c2_415, %c27_416, %c0_417] : memref<1x1x4x36x128xbf16, #tpu.memory_space<vmem>>, vector<1x1x1x9x128xbf16>
    %334 = vector.shape_cast %333 : vector<1x1x1x9x128xbf16> to vector<9x128xbf16>
    %335 = vector.shape_cast %332 : vector<9x128xbf16> to vector<1x1x1x9x128xbf16>
    tpu.vector_store %arg5[%c0_413, %c0_414, %c2_415, %c27_416, %c0_417], %335 {strides = array<i32>} : memref<1x1x4x36x128xbf16, #tpu.memory_space<vmem>>, vector<1x1x1x9x128xbf16>,
    %cst_418 = arith.constant 0.000000e+00 : f32
    %336 = vector.broadcast %cst_418 : f32 to vector<9x128xf32>
    %c0_419 = arith.constant 0 : index
    %c0_420 = arith.constant 0 : index
    %c2_421 = arith.constant 2 : index
    %c0_422 = arith.constant 0 : index
    %c2_423 = arith.constant 2 : index
    %337 = vector.load %arg2[%c0_419, %c0_420, %c2_421, %c0_422, %c2_423] : memref<1x1x4x10x128xf32, #tpu.memory_space<vmem>>, vector<1x1x1x9x8xf32>
    %338 = vector.shape_cast %337 : vector<1x1x1x9x8xf32> to vector<9x8xf32>
    %c0_424 = arith.constant 0 : index
    %c0_425 = arith.constant 0 : index
    %c0_426 = arith.constant 0 : index
    %339 = vector.load %arg3[%c0_424, %c0_425, %c0_426] : memref<3x8x128xf32, #tpu.memory_space<vmem>>, vector<1x8x128xf32>
    %340 = vector.shape_cast %339 : vector<1x8x128xf32> to vector<8x128xf32>
    %cst_427 = arith.constant dense<0.000000e+00> : vector<9x128xf32>
    %341 = tpu.matmul %338, %340, %cst_427 {dimension_numbers = #tpu.dot_dimension_numbers<[1], [0], [0], [1], [0, 0, 1, 1], [], []>} : vector<9x8xf32>, vector<8x128xf32>, vector<9x128xf32> -> vector<9x128xf32>
    %342 = arith.addf %336, %341 : vector<9x128xf32>
    %c0_428 = arith.constant 0 : index
    %c0_429 = arith.constant 0 : index
    %c3_430 = arith.constant 3 : index
    %c0_431 = arith.constant 0 : index
    %c2_432 = arith.constant 2 : index
    %343 = vector.load %arg2[%c0_428, %c0_429, %c3_430, %c0_431, %c2_432] : memref<1x1x4x10x128xf32, #tpu.memory_space<vmem>>, vector<1x1x1x9x8xf32>
    %344 = vector.shape_cast %343 : vector<1x1x1x9x8xf32> to vector<9x8xf32>
    %c1_433 = arith.constant 1 : index
    %c0_434 = arith.constant 0 : index
    %c0_435 = arith.constant 0 : index
    %345 = vector.load %arg3[%c1_433, %c0_434, %c0_435] : memref<3x8x128xf32, #tpu.memory_space<vmem>>, vector<1x8x128xf32>
    %346 = vector.shape_cast %345 : vector<1x8x128xf32> to vector<8x128xf32>
    %cst_436 = arith.constant dense<0.000000e+00> : vector<9x128xf32>
    %347 = tpu.matmul %344, %346, %cst_436 {dimension_numbers = #tpu.dot_dimension_numbers<[1], [0], [0], [1], [0, 0, 1, 1], [], []>} : vector<9x8xf32>, vector<8x128xf32>, vector<9x128xf32> -> vector<9x128xf32>
    %348 = arith.addf %342, %347 : vector<9x128xf32>
    %c0_437 = arith.constant 0 : index
    %c0_438 = arith.constant 0 : index
    %c0_439 = arith.constant 0 : index
    %c1_440 = arith.constant 1 : index
    %c2_441 = arith.constant 2 : index
    %349 = vector.load %arg2[%c0_437, %c0_438, %c0_439, %c1_440, %c2_441] : memref<1x1x4x10x128xf32, #tpu.memory_space<vmem>>, vector<1x1x1x9x8xf32>
    %350 = vector.shape_cast %349 : vector<1x1x1x9x8xf32> to vector<9x8xf32>
    %c2_442 = arith.constant 2 : index
    %c0_443 = arith.constant 0 : index
    %c0_444 = arith.constant 0 : index
    %351 = vector.load %arg3[%c2_442, %c0_443, %c0_444] : memref<3x8x128xf32, #tpu.memory_space<vmem>>, vector<1x8x128xf32>
    %352 = vector.shape_cast %351 : vector<1x8x128xf32> to vector<8x128xf32>
    %cst_445 = arith.constant dense<0.000000e+00> : vector<9x128xf32>
    %353 = tpu.matmul %350, %352, %cst_445 {dimension_numbers = #tpu.dot_dimension_numbers<[1], [0], [0], [1], [0, 0, 1, 1], [], []>} : vector<9x8xf32>, vector<8x128xf32>, vector<9x128xf32> -> vector<9x128xf32>
    %354 = arith.addf %348, %353 : vector<9x128xf32>
    %c0_446 = arith.constant 0 : index
    %c0_447 = arith.constant 0 : index
    %355 = vector.load %arg4[%c0_446, %c0_447] : memref<1x128xf32, #tpu.memory_space<vmem>>, vector<1x128xf32>
    %356 = vector.broadcast %355 : vector<1x128xf32> to vector<9x128xf32>
    %357 = arith.addf %354, %356 : vector<9x128xf32>
    %cst_448 = arith.constant 0.000000e+00 : f32
    %358 = vector.broadcast %cst_448 : f32 to vector<9x128xf32>
    %359 = arith.maximumf %357, %358 : vector<9x128xf32>
    %360 = arith.truncf %359 : vector<9x128xf32> to vector<9x128xbf16>
    %c0_449 = arith.constant 0 : index
    %c0_450 = arith.constant 0 : index
    %c3_451 = arith.constant 3 : index
    %c0_452 = arith.constant 0 : index
    %c0_453 = arith.constant 0 : index
    %361 = vector.load %arg5[%c0_449, %c0_450, %c3_451, %c0_452, %c0_453] : memref<1x1x4x36x128xbf16, #tpu.memory_space<vmem>>, vector<1x1x1x9x128xbf16>
    %362 = vector.shape_cast %361 : vector<1x1x1x9x128xbf16> to vector<9x128xbf16>
    %363 = vector.shape_cast %360 : vector<9x128xbf16> to vector<1x1x1x9x128xbf16>
    tpu.vector_store %arg5[%c0_449, %c0_450, %c3_451, %c0_452, %c0_453], %363 {strides = array<i32>} : memref<1x1x4x36x128xbf16, #tpu.memory_space<vmem>>, vector<1x1x1x9x128xbf16>,
    %cst_454 = arith.constant 0.000000e+00 : f32
    %364 = vector.broadcast %cst_454 : f32 to vector<9x128xf32>
    %c0_455 = arith.constant 0 : index
    %c0_456 = arith.constant 0 : index
    %c2_457 = arith.constant 2 : index
    %c0_458 = arith.constant 0 : index
    %c6_459 = arith.constant 6 : index
    %365 = vector.load %arg2[%c0_455, %c0_456, %c2_457, %c0_458, %c6_459] : memref<1x1x4x10x128xf32, #tpu.memory_space<vmem>>, vector<1x1x1x9x8xf32>
    %366 = vector.shape_cast %365 : vector<1x1x1x9x8xf32> to vector<9x8xf32>
    %c0_460 = arith.constant 0 : index
    %c0_461 = arith.constant 0 : index
    %c0_462 = arith.constant 0 : index
    %367 = vector.load %arg3[%c0_460, %c0_461, %c0_462] : memref<3x8x128xf32, #tpu.memory_space<vmem>>, vector<1x8x128xf32>
    %368 = vector.shape_cast %367 : vector<1x8x128xf32> to vector<8x128xf32>
    %cst_463 = arith.constant dense<0.000000e+00> : vector<9x128xf32>
    %369 = tpu.matmul %366, %368, %cst_463 {dimension_numbers = #tpu.dot_dimension_numbers<[1], [0], [0], [1], [0, 0, 1, 1], [], []>} : vector<9x8xf32>, vector<8x128xf32>, vector<9x128xf32> -> vector<9x128xf32>
    %370 = arith.addf %364, %369 : vector<9x128xf32>
    %c0_464 = arith.constant 0 : index
    %c0_465 = arith.constant 0 : index
    %c3_466 = arith.constant 3 : index
    %c0_467 = arith.constant 0 : index
    %c6_468 = arith.constant 6 : index
    %371 = vector.load %arg2[%c0_464, %c0_465, %c3_466, %c0_467, %c6_468] : memref<1x1x4x10x128xf32, #tpu.memory_space<vmem>>, vector<1x1x1x9x8xf32>
    %372 = vector.shape_cast %371 : vector<1x1x1x9x8xf32> to vector<9x8xf32>
    %c1_469 = arith.constant 1 : index
    %c0_470 = arith.constant 0 : index
    %c0_471 = arith.constant 0 : index
    %373 = vector.load %arg3[%c1_469, %c0_470, %c0_471] : memref<3x8x128xf32, #tpu.memory_space<vmem>>, vector<1x8x128xf32>
    %374 = vector.shape_cast %373 : vector<1x8x128xf32> to vector<8x128xf32>
    %cst_472 = arith.constant dense<0.000000e+00> : vector<9x128xf32>
    %375 = tpu.matmul %372, %374, %cst_472 {dimension_numbers = #tpu.dot_dimension_numbers<[1], [0], [0], [1], [0, 0, 1, 1], [], []>} : vector<9x8xf32>, vector<8x128xf32>, vector<9x128xf32> -> vector<9x128xf32>
    %376 = arith.addf %370, %375 : vector<9x128xf32>
    %c0_473 = arith.constant 0 : index
    %c0_474 = arith.constant 0 : index
    %c0_475 = arith.constant 0 : index
    %c1_476 = arith.constant 1 : index
    %c6_477 = arith.constant 6 : index
    %377 = vector.load %arg2[%c0_473, %c0_474, %c0_475, %c1_476, %c6_477] : memref<1x1x4x10x128xf32, #tpu.memory_space<vmem>>, vector<1x1x1x9x8xf32>
    %378 = vector.shape_cast %377 : vector<1x1x1x9x8xf32> to vector<9x8xf32>
    %c2_478 = arith.constant 2 : index
    %c0_479 = arith.constant 0 : index
    %c0_480 = arith.constant 0 : index
    %379 = vector.load %arg3[%c2_478, %c0_479, %c0_480] : memref<3x8x128xf32, #tpu.memory_space<vmem>>, vector<1x8x128xf32>
    %380 = vector.shape_cast %379 : vector<1x8x128xf32> to vector<8x128xf32>
    %cst_481 = arith.constant dense<0.000000e+00> : vector<9x128xf32>
    %381 = tpu.matmul %378, %380, %cst_481 {dimension_numbers = #tpu.dot_dimension_numbers<[1], [0], [0], [1], [0, 0, 1, 1], [], []>} : vector<9x8xf32>, vector<8x128xf32>, vector<9x128xf32> -> vector<9x128xf32>
    %382 = arith.addf %376, %381 : vector<9x128xf32>
    %c0_482 = arith.constant 0 : index
    %c0_483 = arith.constant 0 : index
    %383 = vector.load %arg4[%c0_482, %c0_483] : memref<1x128xf32, #tpu.memory_space<vmem>>, vector<1x128xf32>
    %384 = vector.broadcast %383 : vector<1x128xf32> to vector<9x128xf32>
    %385 = arith.addf %382, %384 : vector<9x128xf32>
    %cst_484 = arith.constant 0.000000e+00 : f32
    %386 = vector.broadcast %cst_484 : f32 to vector<9x128xf32>
    %387 = arith.maximumf %385, %386 : vector<9x128xf32>
    %388 = arith.truncf %387 : vector<9x128xf32> to vector<9x128xbf16>
    %c0_485 = arith.constant 0 : index
    %c0_486 = arith.constant 0 : index
    %c3_487 = arith.constant 3 : index
    %c9_488 = arith.constant 9 : index
    %c0_489 = arith.constant 0 : index
    %389 = vector.load %arg5[%c0_485, %c0_486, %c3_487, %c9_488, %c0_489] : memref<1x1x4x36x128xbf16, #tpu.memory_space<vmem>>, vector<1x1x1x9x128xbf16>
    %390 = vector.shape_cast %389 : vector<1x1x1x9x128xbf16> to vector<9x128xbf16>
    %391 = vector.shape_cast %388 : vector<9x128xbf16> to vector<1x1x1x9x128xbf16>
    tpu.vector_store %arg5[%c0_485, %c0_486, %c3_487, %c9_488, %c0_489], %391 {strides = array<i32>} : memref<1x1x4x36x128xbf16, #tpu.memory_space<vmem>>, vector<1x1x1x9x128xbf16>,
    %cst_490 = arith.constant 0.000000e+00 : f32
    %392 = vector.broadcast %cst_490 : f32 to vector<9x128xf32>
    %c0_491 = arith.constant 0 : index
    %c0_492 = arith.constant 0 : index
    %c2_493 = arith.constant 2 : index
    %c0_494 = arith.constant 0 : index
    %c10_495 = arith.constant 10 : index
    %393 = vector.load %arg2[%c0_491, %c0_492, %c2_493, %c0_494, %c10_495] : memref<1x1x4x10x128xf32, #tpu.memory_space<vmem>>, vector<1x1x1x9x8xf32>
    %394 = vector.shape_cast %393 : vector<1x1x1x9x8xf32> to vector<9x8xf32>
    %c0_496 = arith.constant 0 : index
    %c0_497 = arith.constant 0 : index
    %c0_498 = arith.constant 0 : index
    %395 = vector.load %arg3[%c0_496, %c0_497, %c0_498] : memref<3x8x128xf32, #tpu.memory_space<vmem>>, vector<1x8x128xf32>
    %396 = vector.shape_cast %395 : vector<1x8x128xf32> to vector<8x128xf32>
    %cst_499 = arith.constant dense<0.000000e+00> : vector<9x128xf32>
    %397 = tpu.matmul %394, %396, %cst_499 {dimension_numbers = #tpu.dot_dimension_numbers<[1], [0], [0], [1], [0, 0, 1, 1], [], []>} : vector<9x8xf32>, vector<8x128xf32>, vector<9x128xf32> -> vector<9x128xf32>
    %398 = arith.addf %392, %397 : vector<9x128xf32>
    %c0_500 = arith.constant 0 : index
    %c0_501 = arith.constant 0 : index
    %c3_502 = arith.constant 3 : index
    %c0_503 = arith.constant 0 : index
    %c10_504 = arith.constant 10 : index
    %399 = vector.load %arg2[%c0_500, %c0_501, %c3_502, %c0_503, %c10_504] : memref<1x1x4x10x128xf32, #tpu.memory_space<vmem>>, vector<1x1x1x9x8xf32>
    %400 = vector.shape_cast %399 : vector<1x1x1x9x8xf32> to vector<9x8xf32>
    %c1_505 = arith.constant 1 : index
    %c0_506 = arith.constant 0 : index
    %c0_507 = arith.constant 0 : index
    %401 = vector.load %arg3[%c1_505, %c0_506, %c0_507] : memref<3x8x128xf32, #tpu.memory_space<vmem>>, vector<1x8x128xf32>
    %402 = vector.shape_cast %401 : vector<1x8x128xf32> to vector<8x128xf32>
    %cst_508 = arith.constant dense<0.000000e+00> : vector<9x128xf32>
    %403 = tpu.matmul %400, %402, %cst_508 {dimension_numbers = #tpu.dot_dimension_numbers<[1], [0], [0], [1], [0, 0, 1, 1], [], []>} : vector<9x8xf32>, vector<8x128xf32>, vector<9x128xf32> -> vector<9x128xf32>
    %404 = arith.addf %398, %403 : vector<9x128xf32>
    %c0_509 = arith.constant 0 : index
    %c0_510 = arith.constant 0 : index
    %c0_511 = arith.constant 0 : index
    %c1_512 = arith.constant 1 : index
    %c10_513 = arith.constant 10 : index
    %405 = vector.load %arg2[%c0_509, %c0_510, %c0_511, %c1_512, %c10_513] : memref<1x1x4x10x128xf32, #tpu.memory_space<vmem>>, vector<1x1x1x9x8xf32>
    %406 = vector.shape_cast %405 : vector<1x1x1x9x8xf32> to vector<9x8xf32>
    %c2_514 = arith.constant 2 : index
    %c0_515 = arith.constant 0 : index
    %c0_516 = arith.constant 0 : index
    %407 = vector.load %arg3[%c2_514, %c0_515, %c0_516] : memref<3x8x128xf32, #tpu.memory_space<vmem>>, vector<1x8x128xf32>
    %408 = vector.shape_cast %407 : vector<1x8x128xf32> to vector<8x128xf32>
    %cst_517 = arith.constant dense<0.000000e+00> : vector<9x128xf32>
    %409 = tpu.matmul %406, %408, %cst_517 {dimension_numbers = #tpu.dot_dimension_numbers<[1], [0], [0], [1], [0, 0, 1, 1], [], []>} : vector<9x8xf32>, vector<8x128xf32>, vector<9x128xf32> -> vector<9x128xf32>
    %410 = arith.addf %404, %409 : vector<9x128xf32>
    %c0_518 = arith.constant 0 : index
    %c0_519 = arith.constant 0 : index
    %411 = vector.load %arg4[%c0_518, %c0_519] : memref<1x128xf32, #tpu.memory_space<vmem>>, vector<1x128xf32>
    %412 = vector.broadcast %411 : vector<1x128xf32> to vector<9x128xf32>
    %413 = arith.addf %410, %412 : vector<9x128xf32>
    %cst_520 = arith.constant 0.000000e+00 : f32
    %414 = vector.broadcast %cst_520 : f32 to vector<9x128xf32>
    %415 = arith.maximumf %413, %414 : vector<9x128xf32>
    %416 = arith.truncf %415 : vector<9x128xf32> to vector<9x128xbf16>
    %c0_521 = arith.constant 0 : index
    %c0_522 = arith.constant 0 : index
    %c3_523 = arith.constant 3 : index
    %c18_524 = arith.constant 18 : index
    %c0_525 = arith.constant 0 : index
    %417 = vector.load %arg5[%c0_521, %c0_522, %c3_523, %c18_524, %c0_525] : memref<1x1x4x36x128xbf16, #tpu.memory_space<vmem>>, vector<1x1x1x9x128xbf16>
    %418 = vector.shape_cast %417 : vector<1x1x1x9x128xbf16> to vector<9x128xbf16>
    %419 = vector.shape_cast %416 : vector<9x128xbf16> to vector<1x1x1x9x128xbf16>
    tpu.vector_store %arg5[%c0_521, %c0_522, %c3_523, %c18_524, %c0_525], %419 {strides = array<i32>} : memref<1x1x4x36x128xbf16, #tpu.memory_space<vmem>>, vector<1x1x1x9x128xbf16>,
    %cst_526 = arith.constant 0.000000e+00 : f32
    %420 = vector.broadcast %cst_526 : f32 to vector<9x128xf32>
    %c0_527 = arith.constant 0 : index
    %c0_528 = arith.constant 0 : index
    %c2_529 = arith.constant 2 : index
    %c0_530 = arith.constant 0 : index
    %c14_531 = arith.constant 14 : index
    %421 = vector.load %arg2[%c0_527, %c0_528, %c2_529, %c0_530, %c14_531] : memref<1x1x4x10x128xf32, #tpu.memory_space<vmem>>, vector<1x1x1x9x8xf32>
    %422 = vector.shape_cast %421 : vector<1x1x1x9x8xf32> to vector<9x8xf32>
    %c0_532 = arith.constant 0 : index
    %c0_533 = arith.constant 0 : index
    %c0_534 = arith.constant 0 : index
    %423 = vector.load %arg3[%c0_532, %c0_533, %c0_534] : memref<3x8x128xf32, #tpu.memory_space<vmem>>, vector<1x8x128xf32>
    %424 = vector.shape_cast %423 : vector<1x8x128xf32> to vector<8x128xf32>
    %cst_535 = arith.constant dense<0.000000e+00> : vector<9x128xf32>
    %425 = tpu.matmul %422, %424, %cst_535 {dimension_numbers = #tpu.dot_dimension_numbers<[1], [0], [0], [1], [0, 0, 1, 1], [], []>} : vector<9x8xf32>, vector<8x128xf32>, vector<9x128xf32> -> vector<9x128xf32>
    %426 = arith.addf %420, %425 : vector<9x128xf32>
    %c0_536 = arith.constant 0 : index
    %c0_537 = arith.constant 0 : index
    %c3_538 = arith.constant 3 : index
    %c0_539 = arith.constant 0 : index
    %c14_540 = arith.constant 14 : index
    %427 = vector.load %arg2[%c0_536, %c0_537, %c3_538, %c0_539, %c14_540] : memref<1x1x4x10x128xf32, #tpu.memory_space<vmem>>, vector<1x1x1x9x8xf32>
    %428 = vector.shape_cast %427 : vector<1x1x1x9x8xf32> to vector<9x8xf32>
    %c1_541 = arith.constant 1 : index
    %c0_542 = arith.constant 0 : index
    %c0_543 = arith.constant 0 : index
    %429 = vector.load %arg3[%c1_541, %c0_542, %c0_543] : memref<3x8x128xf32, #tpu.memory_space<vmem>>, vector<1x8x128xf32>
    %430 = vector.shape_cast %429 : vector<1x8x128xf32> to vector<8x128xf32>
    %cst_544 = arith.constant dense<0.000000e+00> : vector<9x128xf32>
    %431 = tpu.matmul %428, %430, %cst_544 {dimension_numbers = #tpu.dot_dimension_numbers<[1], [0], [0], [1], [0, 0, 1, 1], [], []>} : vector<9x8xf32>, vector<8x128xf32>, vector<9x128xf32> -> vector<9x128xf32>
    %432 = arith.addf %426, %431 : vector<9x128xf32>
    %c0_545 = arith.constant 0 : index
    %c0_546 = arith.constant 0 : index
    %c0_547 = arith.constant 0 : index
    %c1_548 = arith.constant 1 : index
    %c14_549 = arith.constant 14 : index
    %433 = vector.load %arg2[%c0_545, %c0_546, %c0_547, %c1_548, %c14_549] : memref<1x1x4x10x128xf32, #tpu.memory_space<vmem>>, vector<1x1x1x9x8xf32>
    %434 = vector.shape_cast %433 : vector<1x1x1x9x8xf32> to vector<9x8xf32>
    %c2_550 = arith.constant 2 : index
    %c0_551 = arith.constant 0 : index
    %c0_552 = arith.constant 0 : index
    %435 = vector.load %arg3[%c2_550, %c0_551, %c0_552] : memref<3x8x128xf32, #tpu.memory_space<vmem>>, vector<1x8x128xf32>
    %436 = vector.shape_cast %435 : vector<1x8x128xf32> to vector<8x128xf32>
    %cst_553 = arith.constant dense<0.000000e+00> : vector<9x128xf32>
    %437 = tpu.matmul %434, %436, %cst_553 {dimension_numbers = #tpu.dot_dimension_numbers<[1], [0], [0], [1], [0, 0, 1, 1], [], []>} : vector<9x8xf32>, vector<8x128xf32>, vector<9x128xf32> -> vector<9x128xf32>
    %438 = arith.addf %432, %437 : vector<9x128xf32>
    %c0_554 = arith.constant 0 : index
    %c0_555 = arith.constant 0 : index
    %439 = vector.load %arg4[%c0_554, %c0_555] : memref<1x128xf32, #tpu.memory_space<vmem>>, vector<1x128xf32>
    %440 = vector.broadcast %439 : vector<1x128xf32> to vector<9x128xf32>
    %441 = arith.addf %438, %440 : vector<9x128xf32>
    %cst_556 = arith.constant 0.000000e+00 : f32
    %442 = vector.broadcast %cst_556 : f32 to vector<9x128xf32>
    %443 = arith.maximumf %441, %442 : vector<9x128xf32>
    %444 = arith.truncf %443 : vector<9x128xf32> to vector<9x128xbf16>
    %c0_557 = arith.constant 0 : index
    %c0_558 = arith.constant 0 : index
    %c3_559 = arith.constant 3 : index
    %c27_560 = arith.constant 27 : index
    %c0_561 = arith.constant 0 : index
    %445 = vector.load %arg5[%c0_557, %c0_558, %c3_559, %c27_560, %c0_561] : memref<1x1x4x36x128xbf16, #tpu.memory_space<vmem>>, vector<1x1x1x9x128xbf16>
    %446 = vector.shape_cast %445 : vector<1x1x1x9x128xbf16> to vector<9x128xbf16>
    %447 = vector.shape_cast %444 : vector<9x128xbf16> to vector<1x1x1x9x128xbf16>
    tpu.vector_store %arg5[%c0_557, %c0_558, %c3_559, %c27_560, %c0_561], %447 {strides = array<i32>} : memref<1x1x4x36x128xbf16, #tpu.memory_space<vmem>>, vector<1x1x1x9x128xbf16>,
    return
  }
  func.func @transform_0(%arg0: i32, %arg1: i32) -> (i32, i32, i32, i32, i32) {
    %c0_i32 = arith.constant 0 : i32
    %c0_i32_0 = arith.constant 0 : i32
    %c0_i32_1 = arith.constant 0 : i32
    %c0_i32_2 = arith.constant 0 : i32
    return %arg0, %arg1, %c0_i32, %c0_i32_0, %c0_i32_1 : i32, i32, i32, i32, i32
  }
  func.func @transform_1(%arg0: i32, %arg1: i32) -> (i32, i32, i32) {
    %c0_i32 = arith.constant 0 : i32
    %c0_i32_0 = arith.constant 0 : i32
    %c0_i32_1 = arith.constant 0 : i32
    %c0_i32_2 = arith.constant 0 : i32
    return %c0_i32, %c0_i32_0, %c0_i32_1 : i32, i32, i32
  }
  func.func @transform_2(%arg0: i32, %arg1: i32) -> (i32, i32) {
    %c0_i32 = arith.constant 0 : i32
    %c0_i32_0 = arith.constant 0 : i32
    %c0_i32_1 = arith.constant 0 : i32
    return %c0_i32, %c0_i32_0 : i32, i32
  }
  func.func @transform_3(%arg0: i32, %arg1: i32) -> (i32, i32, i32, i32, i32) {
    %c0_i32 = arith.constant 0 : i32
    %c0_i32_0 = arith.constant 0 : i32
    %c0_i32_1 = arith.constant 0 : i32
    %c0_i32_2 = arith.constant 0 : i32
    return %arg0, %arg1, %c0_i32, %c0_i32_0, %c0_i32_1 : i32, i32, i32, i32, i32
  }
}

</mosaic_0001>

<bundles_post_ra>
// kernel: tpu_custom_call.1
= control target key start
LH: loop header
LB: loop body
LE: loop exit
PB: predicated region body
PF: predicated region fallthrough
CT: control target
= control target key end

     0   :  { %8 = vsyncpa [#allocation3], 0  ;;  %s6982_s0 = inlined_call_operand.hbm [shape: f32[2,1,4,10,128], index: 0, kind: input, shape index: {}]   ;;  %s6983_s1 = inlined_call_operand.hbm [shape: f32[3,8,128], index: 1, kind: input, shape index: {}]   ;;  %s6984_s2 = inlined_call_operand.hbm [shape: f32[1,128], index: 2, kind: input, shape index: {}]   ;;  %s6985_s3 = inlined_call_operand.hbm [shape: bf16[2,1,4,36,128], index: 3, kind: output, shape index: {}]  }
   0x1   :  { %10 = vsyncpa [#allocation3 + $0x1], 0 }
   0x2   :  { %11 = vsyncpa [#allocation6], 0 }
   0x3   :  { %12 = vsyncpa [#allocation4], 0 }
   0x4   :  { %14 = vsyncpa [#allocation4 + $0x1], 0  ;;  %s6149_s12 = smov 0   ;;  %s6151_s13 = smov 0  }
   0x5   :  { %s6153_s14 = smov 0   ;;  %s6155_s15 = smov 0  }
   0x6   :  { %s6157_s16 = smov 0   ;;  %s6159_s17 = smov 0  }
   0x7 LB: > { %s5103_s18 = sadd.s32 4294967295, %s6112_s17   ;;  %s5104_s19 = sadd.s32 4294967294, %s6112_s17   ;;  %s6112_s17 = sphi %s6159_s17, %s20_s17   ;;  %s6108_s16 = sphi %s6157_s16, %s7021_s16   ;;  %s6104_s15 = sphi %s6155_s15, %s7020_s15   ;;  %s6100_s14 = sphi %s6153_s14, %s7019_s14   ;;  %s6096_s13 = sphi %s6151_s13, %s7018_s13   ;;  %s6092_s12 = sphi %s6149_s12, %s7017_s12  }
   0x8   : > { %p54_p0 = scmp.ne.s32.totalorder %s6096_s13, %s6092_s12  ;;  %p6183_p1 = scmp.eq.s32.totalorder %s5103_s18, 0 }
   0x9   : > { %p6187_p2 = scmp.eq.s32.totalorder %s5103_s18, 1  ;;  %p128_p3 = scmp.eq.s32.totalorder %s5104_s19, 1 }
   0xa   : > { %s6990_s20 = scalar_select %p6183_p1, 1, 0 }
   0xb   : > { %p6193_p4 = por %p6183_p1, %p54_p0  ;;  %p5105_p5 = scmp.ge.s32.totalorder %s6112_s17, 1 }
   0xc   : > { %p6198_p6 = por %p128_p3, %p54_p0  ;;  %p135_p7 = scmp.lt.s32.totalorder %s6112_s17, 3 }
   0xd   : > { %s6992_s22 = scalar_select %p6193_p4, 1, 0 }
   0xe   : > { %s6993_s23 = scalar_select %p6198_p6, 1, 0 }
   0xf   : > { %p6203_p8 = pnand %p5105_p5, %p135_p7  ;;  %s6114_s25 = smov [#allocation5]  }
  0x10   : > { %s147_s26 = sshll.u32 %s6114_s25, 4  ;;  %s6115_s28 = smov [#allocation7]   ;;  %s6207_s26 = int_to_ptr.vmem [resolvable:$true] %s147_s26 }
  0x11   : > { %p5858_p9 = pneg %p6203_p8  ;;  %s161_s29 = sshll.u32 %s6115_s28, 4  ;;  %s6218_s29 = int_to_ptr.vmem [resolvable:$true] %s161_s29 }
  0x12   : > { %s5940_s5 = scalar_lea.hbm %s6983_s1, 384 }
  0x13   : > { %p6214_p11 = pnand %p5858_p9, %p6183_p1  ;;  %p5941_p12 = scmp.ne.s32.totalorder %s6983_s1, %s5940_s5 }
  0x14   : > { %p5947_p5 = scmp.lt.u32.totalorder %s5940_s5, %s6983_s1 }
  0x15   : > { %p5942_p13 = pneg %p6214_p11 }
  0x17   : > { %p5943_p0 = pnand %p5942_p13, %p5941_p12 }
  0x19   : > { %p5944_p3 = pneg %p5943_p0 }
  0x1b   : > { %p5949_p7 = pnand %p5947_p5, %p5944_p3 }
  0x1d   : > { %5952 = shalt.err (!%p5949_p7)
}
  0x1e   : > { %s5953_s10 = scalar_lea.vmem %s6207_s26, 384  ;;  %p5961_p1 = scmp.lt.s32.totalorder %s6207_s26, %s6207_s26 }
  0x1f   : > { %p5954_p9 = scmp.ne.s32.totalorder %s6207_s26, %s5953_s10  ;;  %p5962_p12 = scmp.lt.s32.totalorder %s5953_s10, %s5953_s10 }
  0x21   : > { %p5956_p10 = pnand %p5954_p9, %p5942_p13  ;;  %p5963_p0 = por %p5962_p12, %p5961_p1 }
  0x23   : > { %p5957_p6 = pneg %p5956_p10 }
  0x25   : > { %p5964_p4 = pnand %p5963_p0, %p5957_p6 }
  0x27   : > { %5967 = shalt.err (!%p5964_p4)
}
  0x28   : > { %s6116_s11 = smov 128   ;;  %s6117_s18 = smov 8  }
  0x29   : > { %5861 = dma.hbm_to_vmem [thread:$0]  (!%p6214_p11), %s6983_s1, 384, %s6207_s26, [#allocation6], %s6116_s11, %s6116_s11, %s6117_s18  }
  0x2a   : > { %s5968_s4 = scalar_lea.hbm %s6984_s2, 16 }
  0x2b   : > { %p5969_p1 = scmp.ne.s32.totalorder %s6984_s2, %s5968_s4  ;;  %p5975_p10 = scmp.lt.u32.totalorder %s5968_s4, %s6984_s2 }
  0x2d   : > { %p5971_p4 = pnand %p5969_p1, %p5942_p13 }
  0x2f   : > { %p5972_p6 = pneg %p5971_p4 }
  0x31   : > { %p5977_p3 = pnand %p5975_p10, %p5972_p6 }
  0x33   : > { %5980 = shalt.err (!%p5977_p3)
}
  0x34   : > { %s5981_s26 = scalar_lea.vmem %s6218_s29, 16  ;;  %s5988_s9 = scalar_lea.vmem %s6218_s29, 32 }
  0x35   : > { %p5982_p5 = scmp.ne.s32.totalorder %s6218_s29, %s5981_s26  ;;  %p5989_p12 = scmp.lt.s32.totalorder %s6218_s29, %s6218_s29 }
  0x36   : > { %p5990_p0 = scmp.lt.s32.totalorder %s5988_s9, %s5981_s26 }
  0x37   : > { %p5984_p7 = pnand %p5982_p5, %p5942_p13 }
  0x38   : > { %p5991_p1 = por %p5990_p0, %p5989_p12 }
  0x39   : > { %p5985_p9 = pneg %p5984_p7 }
  0x3b   : > { %p5992_p4 = pnand %p5991_p1, %p5985_p9 }
  0x3d   : > { %5995 = shalt.err (!%p5992_p4)
}
  0x3e   : > { %5864 = dma.hbm_to_vmem [thread:$0]  (!%p6214_p11), %s6984_s2, 16, %s6218_s29, [#allocation6]  }
  0x3f   : > { %s32_s25 = sadd.s32 1, %s6108_s16  ;;  %s41_s28 = sadd.s32 1, %s6100_s14 }
  0x40   : > { %p34_p13 = scmp.ge.s32.totalorder %s32_s25, 2  ;;  %p48_p6 = scmp.ne.s32.totalorder %s6100_s14, %s6096_s13 }
  0x41   : > { %p49_p10 = scmp.eq.s32.totalorder %s6112_s17, 0  ;;  %p5875_p3 = scmp.lt.s32.totalorder %s6112_s17, 2 }
  0x42   : > { %s7023_s25 = smov (%p34_p13, %s32_s25), 0  ;;  %p6286_p7 = por %p6187_p2, %p48_p6 }
  0x43   : > { %p50_p5 = por %p49_p10, %p48_p6  ;;  %s36_s30 = ssub.s32 %s6108_s16, %s7023_s25 }
  0x44   : > { %s6996_s27 = scalar_select %p6286_p7, 1, 0 }
  0x45   : > { %s172_s4 = sand.u32 1, %s6100_s14   ;;  %p39_p9 = scmp.eq.s32.totalorder %s36_s30, 0 }
  0x46   : > { %s5109_s29 = sshll.u32 %s172_s4, 6  ;;  %s5363_s5 = sshll.u32 %s6108_s16, 10 }
  0x47   : > { %s6295_s6 = scalar_select %p39_p9, %s6100_s14, %s41_s28  }
  0x48   : > { %s6300_s26 = scalar_lea.hbm %s6982_s0, %s5363_s5  ;;  %s176_s21 = scalar_lea.vmem [#allocation2], %s5109_s29 }
  0x49   : > { %s185_s9 = sshll.u32 %s176_s21, 4  ;;  %p6304_p2 = pnand %p5875_p3, %p50_p5  ;;  %s6308_s9 = int_to_ptr.vmem [resolvable:$true] %s185_s9 }
  0x4a   : > { %s6310_s19 = scalar_lea.sflag [#allocation3], %s172_s4  ;;  %s5996_s28 = scalar_lea.hbm %s6300_s26, 1024 }
  0x4b   : > { %p5997_p11 = scmp.ne.s32.totalorder %s6300_s26, %s5996_s28  ;;  %p5998_p12 = pneg %p6304_p2 }
  0x4c   : > { %s6001_s5 = scalar_lea.hbm %s6982_s0, 2048  ;;  %p6002_p4 = scmp.lt.u32.totalorder %s6300_s26, %s6982_s0 }
  0x4d   : > { %p5999_p0 = pnand %p5998_p12, %p5997_p11  ;;  %p6003_p13 = scmp.lt.u32.totalorder %s6001_s5, %s5996_s28 }
  0x4e   : > { %p6005_p10 = scmp.lt.u32.totalorder %s5996_s28, %s6300_s26 }
  0x4f   : > { %p6000_p1 = pneg %p5999_p0  ;;  %p6004_p6 = por %p6003_p13, %p6002_p4 }
  0x51   : > { %p6006_p3 = por %p6005_p10, %p6004_p6 }
  0x53   : > { %p6007_p5 = pnand %p6006_p3, %p6000_p1 }
  0x55   : > { %6010 = shalt.err (!%p6007_p5)
}
  0x56   : > { %s6011_s4 = scalar_lea.vmem %s6308_s9, 1024  ;;  %s6118_s21 = smov [#allocation2]  }
  0x57   : > { %p6012_p9 = scmp.ne.s32.totalorder %s6308_s9, %s6011_s4  ;;  %s6016_s30 = sshll.u32 %s6118_s21, 4  ;;  %s6017_s30 = int_to_ptr.vmem [resolvable:$false] %s6016_s30 }
  0x58   : > { %s6018_s29 = scalar_lea.vmem %s6017_s30, 2048  ;;  %p6019_p7 = scmp.lt.s32.totalorder %s6308_s9, %s6017_s30 }
  0x59   : > { %p6014_p11 = pnand %p6012_p9, %p5998_p12  ;;  %p6020_p4 = scmp.lt.s32.totalorder %s6018_s29, %s6011_s4 }
  0x5b   : > { %p6015_p0 = pneg %p6014_p11  ;;  %p6021_p13 = por %p6020_p4, %p6019_p7 }
  0x5d   : > { %p6022_p6 = pnand %p6021_p13, %p6015_p0 }
  0x5f   : > { %6025 = shalt.err (!%p6022_p6)
}
  0x60   : > { %5868 = dma.hbm_to_vmem [thread:$0]  (!%p6304_p2), %s6300_s26, 1024, %s6308_s9, %s6310_s19, %s6116_s11, %s6116_s11, %s6117_s18  }
  0x61   : > { %197 = sbr.rel (%p6203_p8) target bundleno = 634 (0x27a), region = 32  ;;  %s6344_s28 = sand.u32 (!%p6203_p8), 1, %s6096_s13  }
  0x62   : > { %s5113_s5 = sshll.u32 (!%p6203_p8), %s6344_s28, 6  ;;  %s200_s7 = scalar_lea.sflag (!%p6203_p8), [#allocation3], %s6344_s28 }
  0x63   : > { %s6348_s8 = scalar_lea.vmem (!%p6203_p8), [#allocation2], %s5113_s5  ;;  %p6998_p7 = scmp.ne.s32.totalorder (!%p6203_p8), %s6992_s22, 0 }
  0x68   : > { %6079 = dma.done.wait (%p6998_p7), %s200_s7, 1024  }
  0x69   : > { %6081 = vsyncadd (%p6998_p7), %s200_s7, 4294966272  ;;  %p6999_p2 = scmp.ne.s32.totalorder %s6990_s20, 0 }
  0x6b   : > { %6083 = dma.done.wait (%p6999_p2), [#allocation6], 400  }
  0x6c   : > { %6085 = vsyncadd (%p6999_p2), [#allocation6], 4294966896  ;;  %vm242_vm0 = vcmask 64512   ;;  %v6359_v0 = vld [vmem:[%s6348_s8 + $0x10] sm:$0xff]  ;;  %v6362_v1 = vld [vmem:[%s6348_s8] sm:$0xff]  ;;  %s6119_s24 = smov 124  }
  0x6d   : > { %527 = vrot.lane.b32.xlu0 %v6359_v0, %s6119_s24  ;;  %612 = vrot.lane.b32.xlu1 %v6362_v1, %s6119_s24  ;;  %v6368_v2 = vld [vmem:[#allocation5 + $0x8] sm:$0xff]  ;;  %v5130_v3 = vld [vmem:[%s6348_s8 + $0x18] sm:$0x1]  ;;  %v6380_v5 = vld [vmem:[#allocation5] sm:$0xff]  ;;  %s6120_s20 = smov 120   ;;  %s6121_s22 = smov 116  }
  0x6e   : > { %v520_v4 = vld [vmem:[%s6348_s8 + $0x8] sm:$0x1]  ;;  %5540 = vmatprep.subr.mxu0 %v6368_v2  ;;  %5542 = vmatprep.mubr.msk.f32.mxu0 %vm242_vm0, %v6359_v0  ;;  %v5143_v6 = vld [vmem:[%s6348_s8 + $0x18] sm:$0x1]  ;;  %v6389_v7 = vld [vmem:[%s6348_s8 + $0x20] sm:$0xff]  ;;  %s6122_s11 = smov 126  }
  0x6f   : > { %5541 = vmatpush3.msra.mxu0 %v6368_v2  ;;  %5555 = vmatprep.subr.mxu1 %v6368_v2  ;;  %v5136_v8 = vld [vmem:[%s6348_s8 + $0x28] sm:$0x1]  ;;  %v5117_v9 = vld [vmem:[%s6348_s8 + $0x18] sm:$0x1]  ;;  %v6394_v10 = vld [vmem:[#allocation5 + $0x10] sm:$0xff]  ;;  %s6123_s18 = smov 122  }
  0x70   : > { %5556 = vmatpush3.msra.mxu1 %v6368_v2  ;;  %5545 = vmatprep.subr.mxu0 %v6380_v5  ;;  %v5156_v11 = vld [vmem:[%s6348_s8 + $0x18] sm:$0x1]  ;;  %v235_v12 = vld [vmem:[%s6348_s8 + $0x8] sm:$0x1]  ;;  %s6124_s26 = smov 118   ;;  %s6125_s9 = smov 114  }
  0x71   : > { %529 = vrot.lane.b32.xlu0 %v5130_v3, %s6119_s24  ;;  %614 = vrot.lane.b32.xlu1 %v520_v4, %s6119_s24  ;;  %v826_v13 = vld [vmem:[%s6348_s8 + $0x8] sm:$0x1]  ;;  %v5169_v17 = vld [vmem:[%s6348_s8 + $0x18] sm:$0x1]  ;;  %s5844_s10 = smul.u32 80, %s6344_s28  ;;  %vm513_vm1 = vcmask 1040384  }
  0x72   : > { %5560 = vmatprep.subr.mxu1 %v6380_v5  ;;  %5543 = vmatmul.mubr.msk.f32.vlgmr.msra.gmra.mrb[0].mxu0 %vm242_vm0, %v5117_v9  ;;  %v1124_v14 = vld [vmem:[%s6348_s8 + $0x8] sm:$0x1]  ;;  %v5185_v19 = vld [vmem:[%s6348_s8 + $0x18] sm:$0x1]  ;;  %v6482_v30 = vld [vmem:[%s6348_s8 + $0x30] sm:$0xff]  ;;  %vm818_vm5 = vcmask 1043456  }
  0x73   : > { %5546 = vmatpush3.msra.mxu0 %v6380_v5  ;;  %5547 = vmatprep.mubr.msk.f32.mxu0 %vm242_vm0, %v6362_v1  ;;  %v5123_v15 = vld [vmem:[%s6348_s8 + $0x28] sm:$0x1]  ;;  %v5201_v23 = vld [vmem:[%s6348_s8 + $0x18] sm:$0x1]  ;;  %v3074_v35 = vld [vmem:[%s6348_s8 + $0x9] sm:$0x1] }
  0x74   : > { %5550 = vmatprep.subr.mxu0 %v6394_v10  ;;  %v5149_v16 = vld [vmem:[%s6348_s8 + $0x28] sm:$0x1]  ;;  %v5217_v25 = vld [vmem:[%s6348_s8 + $0x18] sm:$0x1]  ;;  %v3375_v39 = vld [vmem:[%s6348_s8 + $0x9] sm:$0x1] }
  0x75   : > { %833 = vrot.lane.b32.xlu0 %v6359_v0, %s6120_s20  ;;  %835 = vrot.lane.b32.xlu1 %v5143_v6, %s6120_s20  ;;  %v5162_v18 = vld [vmem:[%s6348_s8 + $0x28] sm:$0x1]  ;;  %v5251_v31 = vld [vmem:[%s6348_s8 + $0x38] sm:$0x1]  ;;  %vm514_vm2 = vsmask.f32 256 }
  0x76   : > { %v1432_v20 = vld [vmem:[%s6348_s8 + $0x8] sm:$0x1]  ;;  %v5267_v33 = vld [vmem:[%s6348_s8 + $0x38] sm:$0x1]  ;;  %v3668_v45 = vld [vmem:[%s6348_s8 + $0x9] sm:$0x1] }
  0x77   : > { %v1722_v21 = vld [vmem:[%s6348_s8 + $0x8] sm:$0x1]  ;;  %v5283_v36 = vld [vmem:[%s6348_s8 + $0x38] sm:$0x1]  ;;  %v3971_v57 = vld [vmem:[%s6348_s8 + $0x9] sm:$0x1] }
  0x78   : > { %v5175_v22 = vld [vmem:[%s6348_s8 + $0x28] sm:$0x1]  ;;  %v5299_v40 = vld [vmem:[%s6348_s8 + $0x38] sm:$0x1]  ;;  %v4261_v63 = vld [vmem:[%s6348_s8 + $0x9] sm:$0x1] }
  0x79   : > { %700 = vrot.lane.b32.xlu0 %v6389_v7, %s6119_s24  ;;  %702 = vrot.lane.b32.xlu1 %v5136_v8, %s6119_s24  ;;  %v5191_v24 = vld [vmem:[%s6348_s8 + $0x28] sm:$0x1]  ;;  %v5315_v48 = vld [vmem:[%s6348_s8 + $0x38] sm:$0x1]  ;;  %vm6724_vm3 = vmand %vm513_vm1, %vm514_vm2  ;;  %s6728_s19 = scalar_lea.vmem [#allocation8], %s5844_s10  ;;  %vm1108_vm9 = vcmask 1044484  }
  0x7a   : > { %5548 = vmatmul.mubr.msk.f32.vlgmr.msra.gmra.mrb[0].mxu0 %vm242_vm0, %v235_v12  ;;  %v2023_v26 = vld [vmem:[%s6348_s8 + $0x8] sm:$0x1]  ;;  %v5331_v60 = vld [vmem:[%s6348_s8 + $0x38] sm:$0x1]  ;;  %vm802_vm4 = vsmask.f32 4368  ;;  %vm6790_vm12 = vmor %vm513_vm1, %vm1108_vm9 }
  0x7b   : > { %5551 = vmatpush3.msra.mxu0 %v6394_v10  ;;  %5552 = vmatprep.mubr.msk.f32.mxu0 %vm242_vm0, %v6389_v7  ;;  %v2316_v27 = vld [vmem:[%s6348_s8 + $0x8] sm:$0x1]  ;;  %v5347_v3 = vld [vmem:[%s6348_s8 + $0x38] sm:$0x1]  ;;  %vm819_vm6 = vsmask.f32 7938  ;;  %vm6772_vm7 = vmor %vm514_vm2, %vm802_vm4 }
  0x7c   : > { %5570 = vmatprep.subr.mxu0 %v6368_v2  ;;  %v5207_v28 = vld [vmem:[%s6348_s8 + $0x28] sm:$0x1]  ;;  %vm6777_vm8 = vmand %vm818_vm5, %vm819_vm6  ;;  %vm1117_vm10 = vcmask 1041408   ;;  %vm1118_vm11 = vsmask.f32 1280  ;;  %vm1424_vm14 = vcmask 1043457  }
  0x7d   : > { %1131 = vrot.lane.b32.xlu0 %v6359_v0, %s6121_s22  ;;  %1133 = vrot.lane.b32.xlu1 %v5156_v11, %s6121_s22  ;;  %v5223_v29 = vld [vmem:[%s6348_s8 + $0x28] sm:$0x1]  ;;  %vm6796_vm13 = vmand %vm1117_vm10, %vm1118_vm11  ;;  %vm1425_vm15 = vsmask.f32 7942  ;;  %s5845_s4 = smul.u32 1280, %s6104_s15  ;;  %s4997_s21 = sshll.u32 %s6728_s19, 4  ;;  %s6928_s21 = int_to_ptr.vmem [resolvable:$true] %s4997_s21 }
  0x7e   : > { %v5249_v32 = vld [vmem:[%s6348_s8 + $0x28] sm:$0x1]  ;;  %vm6808_vm1 = vmand %vm1424_vm14, %vm1425_vm15  ;;  %s4982_s15 = scalar_lea.sflag [#allocation4], %s6344_s28  ;;  %s6026_s7 = scalar_lea.vmem %s6928_s21, 1280 }
  0x7f   : > { %v6497_v34 = vld [vmem:[%s6348_s8 + $0x1] sm:$0xff]  ;;  %s6926_s5 = scalar_lea.hbm %s6985_s3, %s5845_s4  ;;  %p6027_p8 = scmp.ne.s32.totalorder %s6928_s21, %s6026_s7 }
  0x80   : > { %v5265_v37 = vld [vmem:[%s6348_s8 + $0x28] sm:$0x1]  ;;  %p7014_p12 = scmp.ne.s32.totalorder %s6996_s27, 0 }
  0x81   : > { %918 = vrot.lane.b32.xlu0 %v6362_v1, %s6120_s20  ;;  %920 = vrot.lane.b32.xlu1 %v826_v13, %s6120_s20  ;;  %v5281_v38 = vld [vmem:[%s6348_s8 + $0x28] sm:$0x1] }
  0x82   : > { %5553 = vmatmul.mubr.msk.f32.vlgmr.msra.gmra.mrb[0].mxu0 %vm242_vm0, %v5123_v15  ;;  %v5297_v51 = vld [vmem:[%s6348_s8 + $0x28] sm:$0x1]  ;;  %v4562_v15 = vld [vmem:[%s6348_s8 + $0x9] sm:$0x1]  ;;  %p6028_p1 = pnand %p6027_p8, %p7014_p12 }
  0x83   : > { %5571 = vmatpush3.msra.mxu0 %v6368_v2  ;;  %v5313_v54 = vld [vmem:[%s6348_s8 + $0x28] sm:$0x1] }
  0x84   : > { %5575 = vmatprep.subr.mxu0 %v6380_v5  ;;  %v5329_v8 = vld [vmem:[%s6348_s8 + $0x28] sm:$0x1]  ;;  %p6029_p10 = pneg %p6028_p1 }
  0x85   : > { %1216 = vrot.lane.b32.xlu0 %v6362_v1, %s6121_s22  ;;  %1218 = vrot.lane.b32.xlu1 %v1124_v14, %s6121_s22  ;;  %v5345_v12 = vld [vmem:[%s6348_s8 + $0x28] sm:$0x1] }
  0x89   : > { %1006 = vrot.lane.b32.xlu0 %v6389_v7, %s6120_s20  ;;  %1008 = vrot.lane.b32.xlu1 %v5149_v16, %s6120_s20 }
  0x8d   : > { %1439 = vrot.lane.b32.xlu0 %v6359_v0, %s6122_s11  ;;  %1441 = vrot.lane.b32.xlu1 %v5169_v17, %s6122_s11 }
  0x91   : > { %1304 = vrot.lane.b32.xlu0 %v6389_v7, %s6121_s22  ;;  %1306 = vrot.lane.b32.xlu1 %v5162_v18, %s6121_s22  ;;  %v4855_v18 = vld [vmem:[%s6348_s8 + $0x9] sm:$0x1] }
  0x95   : > { %1729 = vrot.lane.b32.xlu0 %v6359_v0, %s6123_s18  ;;  %1731 = vrot.lane.b32.xlu1 %v5185_v19, %s6123_s18 }
  0x99   : > { %1524 = vrot.lane.b32.xlu0 %v6362_v1, %s6122_s11  ;;  %1526 = vrot.lane.b32.xlu1 %v1432_v20, %s6122_s11 }
  0x9d   : > { %1814 = vrot.lane.b32.xlu0 %v6362_v1, %s6123_s18  ;;  %1816 = vrot.lane.b32.xlu1 %v1722_v21, %s6123_s18 }
  0xa1   : > { %1612 = vrot.lane.b32.xlu0 %v6389_v7, %s6122_s11  ;;  %1614 = vrot.lane.b32.xlu1 %v5175_v22, %s6122_s11 }
  0xa5   : > { %2030 = vrot.lane.b32.xlu0 %v6359_v0, %s6124_s26  ;;  %2032 = vrot.lane.b32.xlu1 %v5201_v23, %s6124_s26 }
  0xa9   : > { %1902 = vrot.lane.b32.xlu0 %v6389_v7, %s6123_s18  ;;  %1904 = vrot.lane.b32.xlu1 %v5191_v24, %s6123_s18 }
  0xad   : > { %2323 = vrot.lane.b32.xlu0 %v6359_v0, %s6125_s9  ;;  %2325 = vrot.lane.b32.xlu1 %v5217_v25, %s6125_s9 }
  0xb1   : > { %2115 = vrot.lane.b32.xlu0 %v6362_v1, %s6124_s26  ;;  %2117 = vrot.lane.b32.xlu1 %v2023_v26, %s6124_s26 }
  0xb5   : > { %2408 = vrot.lane.b32.xlu0 %v6362_v1, %s6125_s9  ;;  %2410 = vrot.lane.b32.xlu1 %v2316_v27, %s6125_s9 }
  0xb9   : > { %2203 = vrot.lane.b32.xlu0 %v6389_v7, %s6124_s26  ;;  %2205 = vrot.lane.b32.xlu1 %v5207_v28, %s6124_s26 }
  0xbd   : > { %2496 = vrot.lane.b32.xlu0 %v6389_v7, %s6125_s9  ;;  %2498 = vrot.lane.b32.xlu1 %v5223_v29, %s6125_s9 }
  0xc1   : > { %2905 = vrot.lane.b32.xlu0 %v6482_v30, %s6119_s24  ;;  %2907 = vrot.lane.b32.xlu1 %v5251_v31, %s6119_s24 }
  0xc5   : > { %2990 = vrot.lane.b32.xlu0 %v6389_v7, %s6119_s24  ;;  %2992 = vrot.lane.b32.xlu1 %v5249_v32, %s6119_s24 }
  0xc9   : > { %3206 = vrot.lane.b32.xlu0 %v6482_v30, %s6120_s20  ;;  %3208 = vrot.lane.b32.xlu1 %v5267_v33, %s6120_s20 }
  0xcd   : > { %3078 = vrot.lane.b32.xlu0 %v6497_v34, %s6119_s24  ;;  %3080 = vrot.lane.b32.xlu1 %v3074_v35, %s6119_s24  ;;  %v5235_v35 = vld [vmem:[%s6348_s8 + $0x38] sm:$0x1] }
  0xd1   : > { %3499 = vrot.lane.b32.xlu0 %v6482_v30, %s6121_s22  ;;  %3501 = vrot.lane.b32.xlu1 %v5283_v36, %s6121_s22 }
  0xd5   : > { %3291 = vrot.lane.b32.xlu0 %v6389_v7, %s6120_s20  ;;  %3293 = vrot.lane.b32.xlu1 %v5265_v37, %s6120_s20 }
  0xd9   : > { %3584 = vrot.lane.b32.xlu0 %v6389_v7, %s6121_s22  ;;  %3586 = vrot.lane.b32.xlu1 %v5281_v38, %s6121_s22 }
  0xdd   : > { %3379 = vrot.lane.b32.xlu0 %v6497_v34, %s6120_s20  ;;  %3381 = vrot.lane.b32.xlu1 %v3375_v39, %s6120_s20 }
  0xdf   : > { %v528_v41 = vpop.permute.xlu0 %527  ;;  %v613_v42 = vpop.permute.xlu1 %612 }
  0xe0   : > { %5557 = vmatprep.mubr.msk.f32.mxu1 %vm242_vm0, %v528_v41 }
  0xe1   : > { %3802 = vrot.lane.b32.xlu0 %v6482_v30, %s6122_s11  ;;  %3804 = vrot.lane.b32.xlu1 %v5299_v40, %s6122_s11 }
  0xe3   : > { %v530_v43 = vpop.permute.xlu0 %529  ;;  %v615_v44 = vpop.permute.xlu1 %614 }
  0xe4   : > { %5558 = vmatmul.mubr.msk.f32.vlgmr.msra.gmra.mrb[0].mxu1 %vm242_vm0, %v530_v43  ;;  %v2788_v43 = vld [vmem:[%s6348_s8 + $0x9] sm:$0x1] }
  0xe5   : > { %3672 = vrot.lane.b32.xlu0 %v6497_v34, %s6121_s22  ;;  %5562 = vmatprep.mubr.msk.f32.mxu1 %vm242_vm0, %v613_v42 }
  0xe6   : > { %3674 = vrot.lane.b32.xlu1 %v3668_v45, %s6121_s22  ;;  %5561 = vmatpush3.msra.mxu1 %v6380_v5 }
  0xe7   : > { %v834_v46 = vpop.permute.xlu0 %833  ;;  %v836_v47 = vpop.permute.xlu1 %835  ;;  %5565 = vmatprep.subr.mxu1 %v6394_v10 }
  0xe8   : > { %5572 = vmatprep.mubr.msk.f32.mxu0 %vm242_vm0, %v834_v46 }
  0xe9   : > { %4092 = vrot.lane.b32.xlu0 %v6482_v30, %s6123_s18  ;;  %5573 = vmatmul.mubr.msk.f32.vlgmr.msra.gmra.mrb[2].mxu0 %vm242_vm0, %v836_v47 }
  0xea   : > { %4094 = vrot.lane.b32.xlu1 %v5315_v48, %s6123_s18  ;;  %5576 = vmatpush3.msra.mxu0 %v6380_v5 }
  0xeb   : > { %v701_v49 = vpop.permute.xlu0 %700  ;;  %v703_v50 = vpop.permute.xlu1 %702  ;;  %5580 = vmatprep.subr.mxu0 %v6394_v10 }
  0xec   : > { %5563 = vmatmul.mubr.msk.f32.vlgmr.msra.gmra.mrb[0].mxu1 %vm242_vm0, %v615_v44 }
  0xed   : > { %3887 = vrot.lane.b32.xlu0 %v6389_v7, %s6122_s11  ;;  %5567 = vmatprep.mubr.msk.f32.mxu1 %vm242_vm0, %v701_v49 }
  0xee   : > { %3889 = vrot.lane.b32.xlu1 %v5297_v51, %s6122_s11  ;;  %5566 = vmatpush3.msra.mxu1 %v6394_v10 }
  0xef   : > { %v1132_v52 = vpop.permute.xlu0 %1131  ;;  %v1134_v53 = vpop.permute.xlu1 %1133  ;;  %5585 = vmatprep.subr.mxu1 %v6368_v2 }
  0xf1   : > { %4177 = vrot.lane.b32.xlu0 %v6389_v7, %s6123_s18 }
  0xf2   : > { %4179 = vrot.lane.b32.xlu1 %v5313_v54, %s6123_s18 }
  0xf3   : > { %v919_v55 = vpop.permute.xlu0 %918  ;;  %v921_v56 = vpop.permute.xlu1 %920 }
  0xf4   : > { %5568 = vmatmul.mubr.msk.f32.vlgmr.msra.gmra.mrb[0].mxu1 %vm242_vm0, %v703_v50  ;;  %5577 = vmatprep.mubr.msk.f32.mxu0 %vm242_vm0, %v919_v55 }
  0xf5   : > { %3975 = vrot.lane.b32.xlu0 %v6497_v34, %s6122_s11  ;;  %5578 = vmatmul.mubr.msk.f32.vlgmr.msra.gmra.mrb[2].mxu0 %vm242_vm0, %v921_v56 }
  0xf6   : > { %5587 = vmatprep.mubr.msk.f32.mxu1 %vm242_vm0, %v1132_v52  ;;  %3977 = vrot.lane.b32.xlu1 %v3971_v57, %s6122_s11  ;;  %v6710_v57 = vld [vmem:[#allocation7] ss:$0 sm:$0xff] }
  0xf7   : > { %v1217_v58 = vpop.permute.xlu0 %1216  ;;  %5586 = vmatpush3.msra.mxu1 %v6368_v2  ;;  %v1219_v59 = vpop.permute.xlu1 %1218  ;;  %5581 = vmatpush3.msra.mxu0 %v6394_v10 }
  0xf8   : > { %5588 = vmatmul.mubr.msk.f32.vlgmr.msra.gmra.mrb[2].mxu1 %vm242_vm0, %v1134_v53  ;;  %5590 = vmatprep.subr.mxu1 %v6380_v5 }
  0xf9   : > { %4393 = vrot.lane.b32.xlu0 %v6482_v30, %s6124_s26  ;;  %5592 = vmatprep.mubr.msk.f32.mxu1 %vm242_vm0, %v1217_v58 }
  0xfa   : > { %4395 = vrot.lane.b32.xlu1 %v5331_v60, %s6124_s26  ;;  %5591 = vmatpush3.msra.mxu1 %v6380_v5 }
  0xfb   : > { %v1007_v61 = vpop.permute.xlu0 %1006  ;;  %v1009_v62 = vpop.permute.xlu1 %1008  ;;  %5600 = vmatprep.subr.mxu0 %v6368_v2  ;;  %5595 = vmatprep.subr.mxu1 %v6394_v10 }
  0xfc   : > { %5582 = vmatprep.mubr.msk.f32.mxu0 %vm242_vm0, %v1007_v61 }
  0xfd   : > { %4265 = vrot.lane.b32.xlu0 %v6497_v34, %s6123_s18  ;;  %5583 = vmatmul.mubr.msk.f32.vlgmr.msra.gmra.mrb[2].mxu0 %vm242_vm0, %v1009_v62 }
  0xfe   : > { %4267 = vrot.lane.b32.xlu1 %v4261_v63, %s6123_s18  ;;  %5601 = vmatpush3.msra.mxu0 %v6368_v2 }
  0xff   : > { %v1440_v0 = vpop.permute.xlu0 %1439  ;;  %v1442_v1 = vpop.permute.xlu1 %1441  ;;  %5605 = vmatprep.subr.mxu0 %v6380_v5 }
 0x100   : > { %5593 = vmatmul.mubr.msk.f32.vlgmr.msra.gmra.mrb[2].mxu1 %vm242_vm0, %v1219_v59  ;;  %5602 = vmatprep.mubr.msk.f32.mxu0 %vm242_vm0, %v1440_v0 }
 0x101   : > { %4686 = vrot.lane.b32.xlu0 %v6482_v30, %s6125_s9  ;;  %5603 = vmatmul.mubr.msk.f32.vlgmr.msra.gmra.mrb[4].mxu0 %vm242_vm0, %v1442_v1 }
 0x102   : > { %4688 = vrot.lane.b32.xlu1 %v5347_v3, %s6125_s9  ;;  %5596 = vmatpush3.msra.mxu1 %v6394_v10 }
 0x103   : > { %v1305_v4 = vpop.permute.xlu0 %1304  ;;  %v1307_v6 = vpop.permute.xlu1 %1306  ;;  %5615 = vmatprep.subr.mxu1 %v6368_v2  ;;  %5606 = vmatpush3.msra.mxu0 %v6380_v5 }
 0x104   : > { %5597 = vmatprep.mubr.msk.f32.mxu1 %vm242_vm0, %v1305_v4  ;;  %5610 = vmatprep.subr.mxu0 %v6394_v10  ;;  %v516_v4 = vld [vmem:[%s6728_s19 + $0x4] sm:$0x1] }
 0x105   : > { %4478 = vrot.lane.b32.xlu0 %v6389_v7, %s6124_s26 }
 0x106   : > { %4480 = vrot.lane.b32.xlu1 %v5329_v8, %s6124_s26 }
 0x107   : > { %v1730_v9 = vpop.permute.xlu0 %1729  ;;  %v1732_v11 = vpop.permute.xlu1 %1731 }
 0x108   : > { %5598 = vmatmul.mubr.msk.f32.vlgmr.msra.gmra.mrb[2].mxu1 %vm242_vm0, %v1307_v6 }
 0x109   : > { %4771 = vrot.lane.b32.xlu0 %v6389_v7, %s6125_s9  ;;  %5617 = vmatprep.mubr.msk.f32.mxu1 %vm242_vm0, %v1730_v9 }
 0x10a   : > { %4773 = vrot.lane.b32.xlu1 %v5345_v12, %s6125_s9  ;;  %5616 = vmatpush3.msra.mxu1 %v6368_v2 }
 0x10b   : > { %v1525_v13 = vpop.permute.xlu0 %1524  ;;  %v1527_v14 = vpop.permute.xlu1 %1526  ;;  %5620 = vmatprep.subr.mxu1 %v6380_v5 }
 0x10c   : > { %5618 = vmatmul.mubr.msk.f32.vlgmr.msra.gmra.mrb[4].mxu1 %vm242_vm0, %v1732_v11  ;;  %5607 = vmatprep.mubr.msk.f32.mxu0 %vm242_vm0, %v1525_v13 }
 0x10d   : > { %4566 = vrot.lane.b32.xlu0 %v6497_v34, %s6124_s26  ;;  %5608 = vmatmul.mubr.msk.f32.vlgmr.msra.gmra.mrb[4].mxu0 %vm242_vm0, %v1527_v14 }
 0x10e   : > { %4568 = vrot.lane.b32.xlu1 %v4562_v15, %s6124_s26  ;;  %5621 = vmatpush3.msra.mxu1 %v6380_v5 }
 0x10f   : > { %v1815_v16 = vpop.permute.xlu0 %1814  ;;  %v1817_v17 = vpop.permute.xlu1 %1816  ;;  %5611 = vmatpush3.msra.mxu0 %v6394_v10  ;;  %5625 = vmatprep.subr.mxu1 %v6394_v10 }
 0x110   : > { %5622 = vmatprep.mubr.msk.f32.mxu1 %vm242_vm0, %v1815_v16  ;;  %5630 = vmatprep.subr.mxu0 %v6368_v2 }
 0x111   : > { %4859 = vrot.lane.b32.xlu0 %v6497_v34, %s6125_s9 }
 0x112   : > { %4861 = vrot.lane.b32.xlu1 %v4855_v18, %s6125_s9 }
 0x113   : > { %v1613_v19 = vpop.permute.xlu0 %1612  ;;  %v1615_v20 = vpop.permute.xlu1 %1614 }
 0x114   : > { %5623 = vmatmul.mubr.msk.f32.vlgmr.msra.gmra.mrb[4].mxu1 %vm242_vm0, %v1817_v17  ;;  %5612 = vmatprep.mubr.msk.f32.mxu0 %vm242_vm0, %v1613_v19 }
 0x115   : > { %5613 = vmatmul.mubr.msk.f32.vlgmr.msra.gmra.mrb[4].mxu0 %vm242_vm0, %v1615_v20  ;;  %5626 = vmatpush3.msra.mxu1 %v6394_v10 }
 0x116   : > { %5631 = vmatpush3.msra.mxu0 %v6368_v2  ;;  %5645 = vmatprep.subr.mxu1 %v6368_v2 }
 0x117   : > { %v2031_v21 = vpop.permute.xlu0 %2030  ;;  %v2033_v22 = vpop.permute.xlu1 %2032  ;;  %5635 = vmatprep.subr.mxu0 %v6380_v5 }
 0x118   : > { %5632 = vmatprep.mubr.msk.f32.mxu0 %vm242_vm0, %v2031_v21 }
 0x119   : > { %5633 = vmatmul.mubr.msk.f32.vlgmr.msra.gmra.mrb[6].mxu0 %vm242_vm0, %v2033_v22 }
 0x11a   : > { %5636 = vmatpush3.msra.mxu0 %v6380_v5 }
 0x11b   : > { %v1903_v23 = vpop.permute.xlu0 %1902  ;;  %v1905_v24 = vpop.permute.xlu1 %1904  ;;  %5640 = vmatprep.subr.mxu0 %v6394_v10 }
 0x11c   : > { %5627 = vmatprep.mubr.msk.f32.mxu1 %vm242_vm0, %v1903_v23 }
 0x11d   : > { %5628 = vmatmul.mubr.msk.f32.vlgmr.msra.gmra.mrb[4].mxu1 %vm242_vm0, %v1905_v24 }
 0x11e   : > { %5646 = vmatpush3.msra.mxu1 %v6368_v2 }
 0x11f   : > { %v2324_v25 = vpop.permute.xlu0 %2323  ;;  %v2326_v26 = vpop.permute.xlu1 %2325  ;;  %5650 = vmatprep.subr.mxu1 %v6380_v5 }
 0x120   : > { %5647 = vmatprep.mubr.msk.f32.mxu1 %vm242_vm0, %v2324_v25 }
 0x121   : > { %5648 = vmatmul.mubr.msk.f32.vlgmr.msra.gmra.mrb[6].mxu1 %vm242_vm0, %v2326_v26 }
 0x122   : > { %5651 = vmatpush3.msra.mxu1 %v6380_v5 }
 0x123   : > { %v2116_v27 = vpop.permute.xlu0 %2115  ;;  %v2118_v28 = vpop.permute.xlu1 %2117  ;;  %5655 = vmatprep.subr.mxu1 %v6394_v10 }
 0x124   : > { %5637 = vmatprep.mubr.msk.f32.mxu0 %vm242_vm0, %v2116_v27 }
 0x125   : > { %5638 = vmatmul.mubr.msk.f32.vlgmr.msra.gmra.mrb[6].mxu0 %vm242_vm0, %v2118_v28 }
 0x126   : > { %5641 = vmatpush3.msra.mxu0 %v6394_v10 }
 0x127   : > { %v2409_v29 = vpop.permute.xlu0 %2408  ;;  %v2411_v31 = vpop.permute.xlu1 %2410  ;;  %5660 = vmatprep.subr.mxu0 %v6368_v2 }
 0x128   : > { %5652 = vmatprep.mubr.msk.f32.mxu1 %vm242_vm0, %v2409_v29 }
 0x129   : > { %5653 = vmatmul.mubr.msk.f32.vlgmr.msra.gmra.mrb[6].mxu1 %vm242_vm0, %v2411_v31 }
 0x12a   : > { %5656 = vmatpush3.msra.mxu1 %v6394_v10 }
 0x12b   : > { %v2204_v32 = vpop.permute.xlu0 %2203  ;;  %v2206_v33 = vpop.permute.xlu1 %2205  ;;  %5675 = vmatprep.subr.mxu1 %v6368_v2 }
 0x12c   : > { %5642 = vmatprep.mubr.msk.f32.mxu0 %vm242_vm0, %v2204_v32 }
 0x12d   : > { %5643 = vmatmul.mubr.msk.f32.vlgmr.msra.gmra.mrb[6].mxu0 %vm242_vm0, %v2206_v33 }
 0x12e   : > { %5661 = vmatpush3.msra.mxu0 %v6368_v2  ;;  %5662 = vmatprep.mubr.msk.f32.mxu0 %vm242_vm0, %v6482_v30  ;;  %v5233_v30 = vld [vmem:[%s6348_s8 + $0x28] sm:$0x1]  ;;  %s6126_s8 = smov [#allocation8]  }
 0x12f   : > { %v2497_v36 = vpop.permute.xlu0 %2496  ;;  %v2499_v37 = vpop.permute.xlu1 %2498  ;;  %5665 = vmatprep.subr.mxu0 %v6380_v5  ;;  %s6030_s24 = sshll.u32 %s6126_s8, 4  ;;  %s6031_s24 = int_to_ptr.vmem [resolvable:$false] %s6030_s24 }
 0x130   : > { %5657 = vmatprep.mubr.msk.f32.mxu1 %vm242_vm0, %v2497_v36  ;;  %s6032_s20 = scalar_lea.vmem %s6031_s24, 2560  ;;  %p6033_p3 = scmp.lt.s32.totalorder %s6928_s21, %s6031_s24 }
 0x131   : > { %5658 = vmatmul.mubr.msk.f32.vlgmr.msra.gmra.mrb[6].mxu1 %vm242_vm0, %v2499_v37  ;;  %5663 = vmatmul.mubr.msk.f32.vlgmr.msra.gmra.mrb[8].mxu0 %vm242_vm0, %v5235_v35  ;;  %p6034_p5 = scmp.lt.s32.totalorder %s6032_s20, %s6026_s7 }
 0x132   : > { %5676 = vmatpush3.msra.mxu1 %v6368_v2  ;;  %5666 = vmatpush3.msra.mxu0 %v6380_v5 }
 0x133   : > { %v2906_v38 = vpop.permute.xlu0 %2905  ;;  %v2908_v39 = vpop.permute.xlu1 %2907  ;;  %5667 = vmatprep.mubr.msk.f32.mxu0 %vm242_vm0, %v6389_v7  ;;  %5680 = vmatprep.subr.mxu1 %v6380_v5  ;;  %p6035_p9 = por %p6034_p5, %p6033_p3 }
 0x134   : > { %5677 = vmatprep.mubr.msk.f32.mxu1 %vm242_vm0, %v2906_v38  ;;  %5670 = vmatprep.subr.mxu0 %v6394_v10 }
 0x135   : > { %5678 = vmatmul.mubr.msk.f32.vlgmr.msra.gmra.mrb[8].mxu1 %vm242_vm0, %v2908_v39  ;;  %p6036_p11 = pnand %p6035_p9, %p6029_p10 }
 0x136   : > { %5681 = vmatpush3.msra.mxu1 %v6380_v5 }
 0x137   : > { %v2991_v40 = vpop.permute.xlu0 %2990  ;;  %v2993_v41 = vpop.permute.xlu1 %2992  ;;  %5685 = vmatprep.subr.mxu1 %v6394_v10 }
 0x138   : > { %5682 = vmatprep.mubr.msk.f32.mxu1 %vm242_vm0, %v2991_v40 }
 0x139   : > { %5668 = vmatmul.mubr.msk.f32.vlgmr.msra.gmra.mrb[8].mxu0 %vm242_vm0, %v5233_v30 }
 0x13a   : > { %5671 = vmatpush3.msra.mxu0 %v6394_v10  ;;  %5672 = vmatprep.mubr.msk.f32.mxu0 %vm242_vm0, %v6497_v34 }
 0x13b   : > { %v3207_v7 = vpop.permute.xlu0 %3206  ;;  %v3209_v42 = vpop.permute.xlu1 %3208  ;;  %5690 = vmatprep.subr.mxu0 %v6368_v2 }
 0x13d   : > { %5683 = vmatmul.mubr.msk.f32.vlgmr.msra.gmra.mrb[8].mxu1 %vm242_vm0, %v2993_v41 }
 0x13e   : > { %5686 = vmatpush3.msra.mxu1 %v6394_v10 }
 0x13f   : > { %v3079_v44 = vpop.permute.xlu0 %3078  ;;  %v3081_v45 = vpop.permute.xlu1 %3080  ;;  %5705 = vmatprep.subr.mxu1 %v6368_v2 }
 0x140   : > { %5687 = vmatprep.mubr.msk.f32.mxu1 %vm242_vm0, %v3079_v44 }
 0x141   : > { %5673 = vmatmul.mubr.msk.f32.vlgmr.msra.gmra.mrb[8].mxu0 %vm242_vm0, %v2788_v43 }
 0x142   : > { %5692 = vmatprep.mubr.msk.f32.mxu0 %vm242_vm0, %v3207_v7  ;;  %5691 = vmatpush3.msra.mxu0 %v6368_v2 }
 0x143   : > { %v3500_v34 = vpop.permute.xlu0 %3499  ;;  %v3502_v46 = vpop.permute.xlu1 %3501  ;;  %5695 = vmatprep.subr.mxu0 %v6380_v5 }
 0x145   : > { %5688 = vmatmul.mubr.msk.f32.vlgmr.msra.gmra.mrb[8].mxu1 %vm242_vm0, %v3081_v45  ;;  %5693 = vmatmul.mubr.msk.f32.vlgmr.msra.gmra.mrb[10].mxu0 %vm242_vm0, %v3209_v42 }
 0x146   : > { %5707 = vmatprep.mubr.msk.f32.mxu1 %vm242_vm0, %v3500_v34  ;;  %5706 = vmatpush3.msra.mxu1 %v6368_v2 }
 0x147   : > { %v3292_v47 = vpop.permute.xlu0 %3291  ;;  %v3294_v48 = vpop.permute.xlu1 %3293  ;;  %5696 = vmatpush3.msra.mxu0 %v6380_v5  ;;  %5710 = vmatprep.subr.mxu1 %v6380_v5 }
 0x148   : > { %5697 = vmatprep.mubr.msk.f32.mxu0 %vm242_vm0, %v3292_v47  ;;  %5700 = vmatprep.subr.mxu0 %v6394_v10 }
 0x149   : > { %5708 = vmatmul.mubr.msk.f32.vlgmr.msra.gmra.mrb[10].mxu1 %vm242_vm0, %v3502_v46 }
 0x14a   : > { %5711 = vmatpush3.msra.mxu1 %v6380_v5 }
 0x14b   : > { %v3585_v49 = vpop.permute.xlu0 %3584  ;;  %v3587_v50 = vpop.permute.xlu1 %3586  ;;  %5715 = vmatprep.subr.mxu1 %v6394_v10 }
 0x14c   : > { %5712 = vmatprep.mubr.msk.f32.mxu1 %vm242_vm0, %v3585_v49 }
 0x14d   : > { %5698 = vmatmul.mubr.msk.f32.vlgmr.msra.gmra.mrb[10].mxu0 %vm242_vm0, %v3294_v48 }
 0x14e   : > { %5701 = vmatpush3.msra.mxu0 %v6394_v10 }
 0x14f   : > { %v3380_v51 = vpop.permute.xlu0 %3379  ;;  %v3382_v52 = vpop.permute.xlu1 %3381  ;;  %5720 = vmatprep.subr.mxu0 %v6368_v2 }
 0x150   : > { %5702 = vmatprep.mubr.msk.f32.mxu0 %vm242_vm0, %v3380_v51 }
 0x151   : > { %5713 = vmatmul.mubr.msk.f32.vlgmr.msra.gmra.mrb[10].mxu1 %vm242_vm0, %v3587_v50 }
 0x152   : > { %5716 = vmatpush3.msra.mxu1 %v6394_v10 }
 0x153   : > { %v3803_v53 = vpop.permute.xlu0 %3802  ;;  %v3805_v54 = vpop.permute.xlu1 %3804  ;;  %5735 = vmatprep.subr.mxu1 %v6368_v2 }
 0x155   : > { %5703 = vmatmul.mubr.msk.f32.vlgmr.msra.gmra.mrb[10].mxu0 %vm242_vm0, %v3382_v52  ;;  %v5554_v59 = vpop.f32.mrb[0].mxu0 }
 0x156   : > { %5722 = vmatprep.mubr.msk.f32.mxu0 %vm242_vm0, %v3803_v53  ;;  %5721 = vmatpush3.msra.mxu0 %v6368_v2  ;;  %v501_v61 = vadd.f32 %v5554_v59, %v6710_v57  ;;  %v482_v62 = vpop.f32.mrb[1].mxu0 }
 0x157   : > { %v3673_v55 = vpop.permute.xlu0 %3672  ;;  %5725 = vmatprep.subr.mxu0 %v6380_v5  ;;  %v500_v63 = vadd.f32 %v6710_v57, %v482_v62 }
 0x158   : > { %5717 = vmatprep.mubr.msk.f32.mxu1 %vm242_vm0, %v3673_v55  ;;  %v3675_v56 = vpop.permute.xlu1 %3674  ;;  %v503_v0 = vmax.f32 %v501_v61, 0.0 }
 0x159   : > { %5718 = vmatmul.mubr.msk.f32.vlgmr.msra.gmra.mrb[10].mxu1 %vm242_vm0, %v3675_v56  ;;  %5723 = vmatmul.mubr.msk.f32.vlgmr.msra.gmra.mrb[12].mxu0 %vm242_vm0, %v3805_v54  ;;  %v502_v6 = vmax.f32 %v500_v63, 0.0 }
 0x15a   : > { %5736 = vmatpush3.msra.mxu1 %v6368_v2  ;;  %5726 = vmatpush3.msra.mxu0 %v6380_v5  ;;  %v5365_v9 = vpack.c.bf16 %v503_v0, %v503_v0 }
 0x15b   : > { %v4093_v58 = vpop.permute.xlu0 %4092  ;;  %5740 = vmatprep.subr.mxu1 %v6380_v5  ;;  %5730 = vmatprep.subr.mxu0 %v6394_v10  ;;  %v5364_v11 = vpack.c.bf16 %v502_v6, %v502_v6 }
 0x15c   : > { %5737 = vmatprep.mubr.msk.f32.mxu1 %vm242_vm0, %v4093_v58  ;;  %v4095_v60 = vpop.permute.xlu1 %4094  ;;  %v517_v12 = vsel %vm6724_vm3, %v5365_v9, %v516_v4 }
 0x15d   : > { %5738 = vmatmul.mubr.msk.f32.vlgmr.msra.gmra.mrb[12].mxu1 %vm242_vm0, %v4095_v60  ;;  %518 = vst [vmem:[%s6728_s19 + $0x4] sm:$0x1] %v517_v12  ;;  %512 = vst [vmem:[%s6728_s19] sm:$0xf] %v5364_v11  ;;  %v1120_v60 = vld [vmem:[%s6728_s19 + $0xc] sm:$0x3] }
 0x15e   : > { %5741 = vmatpush3.msra.mxu1 %v6380_v5 }
 0x15f   : > { %v3888_v1 = vpop.permute.xlu0 %3887  ;;  %5745 = vmatprep.subr.mxu1 %v6394_v10 }
 0x160   : > { %v3890_v8 = vpop.permute.xlu1 %3889  ;;  %5727 = vmatprep.mubr.msk.f32.mxu0 %vm242_vm0, %v3888_v1 }
 0x161   : > { %5728 = vmatmul.mubr.msk.f32.vlgmr.msra.gmra.mrb[12].mxu0 %vm242_vm0, %v3890_v8 }
 0x162   : > { %5731 = vmatpush3.msra.mxu0 %v6394_v10 }
 0x163   : > { %v4178_v13 = vpop.permute.xlu0 %4177  ;;  %5750 = vmatprep.subr.mxu0 %v6368_v2 }
 0x164   : > { %5742 = vmatprep.mubr.msk.f32.mxu1 %vm242_vm0, %v4178_v13  ;;  %v4180_v14 = vpop.permute.xlu1 %4179  ;;  %v821_v48 = vld [vmem:[%s6728_s19 + $0x4] sm:$0xf] }
 0x165   : > { %5743 = vmatmul.mubr.msk.f32.vlgmr.msra.gmra.mrb[12].mxu1 %vm242_vm0, %v4180_v14 }
 0x166   : > { %5746 = vmatpush3.msra.mxu1 %v6394_v10 }
 0x167   : > { %v3976_v15 = vpop.permute.xlu0 %3975  ;;  %5765 = vmatprep.subr.mxu1 %v6368_v2 }
 0x168   : > { %v3978_v16 = vpop.permute.xlu1 %3977  ;;  %5732 = vmatprep.mubr.msk.f32.mxu0 %vm242_vm0, %v3976_v15 }
 0x169   : > { %5733 = vmatmul.mubr.msk.f32.vlgmr.msra.gmra.mrb[12].mxu0 %vm242_vm0, %v3978_v16 }
 0x16a   : > { %5751 = vmatpush3.msra.mxu0 %v6368_v2 }
 0x16b   : > { %v4394_v17 = vpop.permute.xlu0 %4393  ;;  %5755 = vmatprep.subr.mxu0 %v6380_v5 }
 0x16c   : > { %v4396_v18 = vpop.permute.xlu1 %4395  ;;  %5752 = vmatprep.mubr.msk.f32.mxu0 %vm242_vm0, %v4394_v17 }
 0x16d   : > { %5753 = vmatmul.mubr.msk.f32.vlgmr.msra.gmra.mrb[14].mxu0 %vm242_vm0, %v4396_v18 }
 0x16e   : > { %5756 = vmatpush3.msra.mxu0 %v6380_v5 }
 0x16f   : > { %v4266_v19 = vpop.permute.xlu0 %4265  ;;  %5760 = vmatprep.subr.mxu0 %v6394_v10 }
 0x170   : > { %5747 = vmatprep.mubr.msk.f32.mxu1 %vm242_vm0, %v4266_v19  ;;  %v4268_v20 = vpop.permute.xlu1 %4267 }
 0x171   : > { %5748 = vmatmul.mubr.msk.f32.vlgmr.msra.gmra.mrb[12].mxu1 %vm242_vm0, %v4268_v20 }
 0x172   : > { %5766 = vmatpush3.msra.mxu1 %v6368_v2 }
 0x173   : > { %v4687_v21 = vpop.permute.xlu0 %4686  ;;  %5770 = vmatprep.subr.mxu1 %v6380_v5 }
 0x174   : > { %5767 = vmatprep.mubr.msk.f32.mxu1 %vm242_vm0, %v4687_v21  ;;  %v4689_v22 = vpop.permute.xlu1 %4688 }
 0x175   : > { %5768 = vmatmul.mubr.msk.f32.vlgmr.msra.gmra.mrb[14].mxu1 %vm242_vm0, %v4689_v22 }
 0x176   : > { %5771 = vmatpush3.msra.mxu1 %v6380_v5 }
 0x177   : > { %v4479_v23 = vpop.permute.xlu0 %4478  ;;  %5775 = vmatprep.subr.mxu1 %v6394_v10 }
 0x178   : > { %v4481_v24 = vpop.permute.xlu1 %4480  ;;  %5757 = vmatprep.mubr.msk.f32.mxu0 %vm242_vm0, %v4479_v23 }
 0x179   : > { %5758 = vmatmul.mubr.msk.f32.vlgmr.msra.gmra.mrb[14].mxu0 %vm242_vm0, %v4481_v24 }
 0x17a   : > { %5761 = vmatpush3.msra.mxu0 %v6394_v10 }
 0x17b   : > { %v4772_v2 = vpop.permute.xlu0 %4771 }
 0x17c   : > { %5772 = vmatprep.mubr.msk.f32.mxu1 %vm242_vm0, %v4772_v2  ;;  %v4774_v25 = vpop.permute.xlu1 %4773 }
 0x17d   : > { %5773 = vmatmul.mubr.msk.f32.vlgmr.msra.gmra.mrb[14].mxu1 %vm242_vm0, %v4774_v25 }
 0x17e   : > { %5776 = vmatpush3.msra.mxu1 %v6394_v10 }
 0x17f   : > { %v4567_v26 = vpop.permute.xlu0 %4566 }
 0x180   : > { %v4569_v5 = vpop.permute.xlu1 %4568  ;;  %5762 = vmatprep.mubr.msk.f32.mxu0 %vm242_vm0, %v4567_v26 }
 0x181   : > { %5763 = vmatmul.mubr.msk.f32.vlgmr.msra.gmra.mrb[14].mxu0 %vm242_vm0, %v4569_v5 }
 0x183   : > { %v4860_v27 = vpop.permute.xlu0 %4859 }
 0x184   : > { %5777 = vmatprep.mubr.msk.f32.mxu1 %vm242_vm0, %v4860_v27  ;;  %v4862_v28 = vpop.permute.xlu1 %4861 }
 0x185   : > { %5778 = vmatmul.mubr.msk.f32.vlgmr.msra.gmra.mrb[14].mxu1 %vm242_vm0, %v4862_v28  ;;  %vm1406_vm0 = vsmask.f32 5392  ;;  %v5182_v28 = vld [vmem:[%s6728_s19 + $0x18] sm:$0x1] }
 0x186   : > { %vm6813_vm2 = vmor %vm1118_vm11, %vm1406_vm0 }
 0x1c7   : > { %v5569_v29 = vpop.f32.mrb[0].mxu1 }
 0x1c8   : > { %v793_v31 = vadd.f32 %v5569_v29, %v6710_v57  ;;  %v774_v32 = vpop.f32.mrb[1].mxu1 }
 0x1c9   : > { %v792_v33 = vadd.f32 %v6710_v57, %v774_v32 }
 0x1ca   : > { %v795_v35 = vmax.f32 %v793_v31, 0.0 }
 0x1cb   : > { %v794_v10 = vmax.f32 %v792_v33, 0.0 }
 0x1cc   : > { %v5367_v37 = vpack.c.bf16 %v795_v35, %v795_v35 }
 0x1cd   : > { %v5366_v36 = vpack.c.bf16 %v794_v10, %v794_v10 }
 0x1ce   : > { %v813_v45 = vshll.u32 %v5367_v37, 16 }
 0x1cf   : > { %v805_v38 = vshrl.u32 %v5366_v36, 16  ;;  %v808_v41 = vshll.u32 %v5366_v36, 16 }
 0x1d0   : > { %v5584_v39 = vpop.f32.mrb[2].mxu0 }
 0x1d1   : > { %v807_v40 = vrot.slane %v805_v38, 7  ;;  %v1099_v7 = vadd.f32 %v5584_v39, %v6710_v57  ;;  %v1080_v42 = vpop.f32.mrb[3].mxu0 }
 0x1d2   : > { %v1098_v44 = vadd.f32 %v6710_v57, %v1080_v42 }
 0x1d3   : > { %v810_v34 = vor.u32 %v808_v41, %v807_v40  ;;  %v811_v46 = vrot.slane %v807_v40, 4  ;;  %v1101_v47 = vmax.f32 %v1099_v7, 0.0 }
 0x1d4   : > { %v1100_v49 = vmax.f32 %v1098_v44, 0.0 }
 0x1d5   : > { %v815_v50 = vsel %vm6772_vm7, %v811_v46, %v813_v45  ;;  %v822_v51 = vsel %vm6777_vm8, %v810_v34, %v821_v48  ;;  %v5369_v52 = vpack.c.bf16 %v1101_v47, %v1101_v47 }
 0x1d6   : > { %823 = vst [vmem:[%s6728_s19 + $0x4] sm:$0xf] %v822_v51  ;;  %824 = vst [vmem:[%s6728_s19 + $0x8] sm:$0x1] %v815_v50  ;;  %v5368_v53 = vpack.c.bf16 %v1100_v49, %v1100_v49 }
 0x1d7   : > { %v1112_v56 = vrot.slane %v5369_v52, 7 }
 0x1d8   : > { %v1110_v54 = vrot.slane %v5368_v53, 7 }
 0x1da   : > { %v1111_v58 = vrot.slane %v1110_v54, 4  ;;  %1116 = vst [vmem:[%s6728_s19 + $0x8] sm:$0xe] %v1110_v54 }
 0x1db   : > { %v5599_v61 = vpop.f32.mrb[2].mxu1 }
 0x1dc   : > { %v1113_v62 = vsel %vm6790_vm12, %v1111_v58, %v1112_v56  ;;  %v1397_v63 = vadd.f32 %v5599_v61, %v6710_v57  ;;  %v1378_v0 = vpop.f32.mrb[3].mxu1 }
 0x1dd   : > { %v1121_v1 = vsel %vm6796_vm13, %v1113_v62, %v1120_v60  ;;  %v1396_v4 = vadd.f32 %v6710_v57, %v1378_v0 }
 0x1de   : > { %1122 = vst [vmem:[%s6728_s19 + $0xc] sm:$0x3] %v1121_v1  ;;  %v1399_v6 = vmax.f32 %v1397_v63, 0.0 }
 0x1df   : > { %v1398_v8 = vmax.f32 %v1396_v4, 0.0 }
 0x1e0   : > { %v5371_v9 = vpack.c.bf16 %v1399_v6, %v1399_v6 }
 0x1e1   : > { %v5370_v11 = vpack.c.bf16 %v1398_v8, %v1398_v8 }
 0x1e2   : > { %v1418_v14 = vshll.u32 %v5371_v9, 16 }
 0x1e3   : > { %v1409_v12 = vshrl.u32 %v5370_v11, 16  ;;  %v1412_v13 = vshll.u32 %v5370_v11, 16  ;;  %v5214_v11 = vld [vmem:[%s6728_s19 + $0x20] sm:$0x3] }
 0x1e4   : > { %v1420_v22 = vrot.slane %v1418_v14, 7 }
 0x1e5   : > { %v1411_v15 = vrot.slane %v1409_v12, 6  ;;  %v1414_v16 = vrot.slane %v1412_v13, 7  ;;  %v1427_v20 = vld [vmem:[%s6728_s19 + $0xc] sm:$0xe] }
 0x1e7   : > { %v1415_v18 = vor.u32 %v1414_v16, %v1411_v15 }
 0x1e8   : > { %v5614_v21 = vpop.f32.mrb[4].mxu0 }
 0x1e9   : > { %v1416_v23 = vrot.slane %v1415_v18, 4  ;;  %v1428_v24 = vsel %vm6808_vm1, %v1415_v18, %v1427_v20  ;;  %v1705_v2 = vadd.f32 %v5614_v21, %v6710_v57  ;;  %v1686_v25 = vpop.f32.mrb[5].mxu0 }
 0x1ea   : > { %1429 = vst [vmem:[%s6728_s19 + $0xc] sm:$0xe] %v1428_v24  ;;  %v1704_v26 = vadd.f32 %v6710_v57, %v1686_v25 }
 0x1eb   : > { %v1421_v5 = vsel %vm6813_vm2, %v1416_v23, %v1420_v22  ;;  %v1707_v27 = vmax.f32 %v1705_v2, 0.0 }
 0x1ec   : > { %1430 = vst [vmem:[%s6728_s19 + $0x10] sm:$0x3] %v1421_v5  ;;  %v1706_v29 = vmax.f32 %v1704_v26, 0.0 }
 0x1ed   : > { %v5373_v31 = vpack.c.bf16 %v1707_v27, %v1707_v27 }
 0x1ee   : > { %v5372_v32 = vpack.c.bf16 %v1706_v29, %v1706_v29 }
 0x1ef   : > { %v1719_v33 = vsel %vm6724_vm3, %v5373_v31, %v5182_v28 }
 0x1f0   : > { %5183 = vst [vmem:[%s6728_s19 + $0x18] sm:$0x1] %v1719_v33  ;;  %5181 = vst [vmem:[%s6728_s19 + $0x14] sm:$0xf] %v5372_v32  ;;  %v5629_v35 = vpop.f32.mrb[4].mxu1 }
 0x1f1   : > { %v1995_v10 = vadd.f32 %v5629_v35, %v6710_v57  ;;  %v1976_v36 = vpop.f32.mrb[5].mxu1  ;;  %v5246_v33 = vld [vmem:[%s6728_s19 + $0x2c] sm:$0x1] }
 0x1f2   : > { %v1994_v37 = vadd.f32 %v6710_v57, %v1976_v36 }
 0x1f3   : > { %v1997_v38 = vmax.f32 %v1995_v10, 0.0 }
 0x1f4   : > { %v1996_v39 = vmax.f32 %v1994_v37, 0.0 }
 0x1f5   : > { %v5375_v41 = vpack.c.bf16 %v1997_v38, %v1997_v38 }
 0x1f6   : > { %v5374_v40 = vpack.c.bf16 %v1996_v39, %v1996_v39 }
 0x1f7   : > { %v2013_v45 = vshll.u32 %v5375_v41, 16  ;;  %v5197_v47 = vld [vmem:[%s6728_s19 + $0x18] sm:$0xf] }
 0x1f8   : > { %v2005_v7 = vshrl.u32 %v5374_v40, 16  ;;  %v2008_v44 = vshll.u32 %v5374_v40, 16 }
 0x1fa   : > { %v2007_v42 = vrot.slane %v2005_v7, 7 }
 0x1fc   : > { %v2010_v34 = vor.u32 %v2008_v44, %v2007_v42  ;;  %v2011_v46 = vrot.slane %v2007_v42, 4 }
 0x1fe   : > { %v2015_v48 = vsel %vm6772_vm7, %v2011_v46, %v2013_v45  ;;  %v2019_v49 = vsel %vm6777_vm8, %v2010_v34, %v5197_v47 }
 0x1ff   : > { %5198 = vst [vmem:[%s6728_s19 + $0x18] sm:$0xf] %v2019_v49  ;;  %5199 = vst [vmem:[%s6728_s19 + $0x1c] sm:$0x1] %v2015_v48 }
 0x200   : > { %v5644_v50 = vpop.f32.mrb[6].mxu0 }
 0x201   : > { %v2296_v51 = vadd.f32 %v5644_v50, %v6710_v57  ;;  %v2277_v52 = vpop.f32.mrb[7].mxu0 }
 0x202   : > { %v2295_v53 = vadd.f32 %v6710_v57, %v2277_v52 }
 0x203   : > { %v2298_v54 = vmax.f32 %v2296_v51, 0.0 }
 0x204   : > { %v2297_v56 = vmax.f32 %v2295_v53, 0.0  ;;  %v5659_v58 = vpop.f32.mrb[6].mxu1 }
 0x205   : > { %v2589_v60 = vadd.f32 %v5659_v58, %v6710_v57  ;;  %v2570_v61 = vpop.f32.mrb[7].mxu1  ;;  %v5377_v62 = vpack.c.bf16 %v2298_v54, %v2298_v54 }
 0x206   : > { %v5376_v63 = vpack.c.bf16 %v2297_v56, %v2297_v56  ;;  %v2588_v0 = vadd.f32 %v6710_v57, %v2570_v61 }
 0x207   : > { %v2591_v1 = vmax.f32 %v2589_v60, 0.0  ;;  %v2307_v8 = vrot.slane %v5377_v62, 7 }
 0x208   : > { %v2305_v4 = vrot.slane %v5376_v63, 7  ;;  %v2590_v6 = vmax.f32 %v2588_v0, 0.0 }
 0x209   : > { %v5379_v12 = vpack.c.bf16 %v2591_v1, %v2591_v1 }
 0x20a   : > { %v2306_v9 = vrot.slane %v2305_v4, 4  ;;  %5213 = vst [vmem:[%s6728_s19 + $0x1c] sm:$0xe] %v2305_v4  ;;  %v5378_v13 = vpack.c.bf16 %v2590_v6, %v2590_v6 }
 0x20b   : > { %v2608_v20 = vshll.u32 %v5379_v12, 16 }
 0x20c   : > { %v2308_v14 = vsel %vm6790_vm12, %v2306_v9, %v2307_v8  ;;  %v2599_v15 = vshrl.u32 %v5378_v13, 16  ;;  %v2602_v16 = vshll.u32 %v5378_v13, 16 }
 0x20d   : > { %v2313_v18 = vsel %vm6796_vm13, %v2308_v14, %v5214_v11  ;;  %v2610_v24 = vrot.slane %v2608_v20, 7 }
 0x20e   : > { %5215 = vst [vmem:[%s6728_s19 + $0x20] sm:$0x3] %v2313_v18  ;;  %v2601_v21 = vrot.slane %v2599_v15, 6  ;;  %v2604_v22 = vrot.slane %v2602_v16, 7  ;;  %v5278_v15 = vld [vmem:[%s6728_s19 + $0x34] sm:$0x3] }
 0x210   : > { %v2605_v23 = vor.u32 %v2604_v22, %v2601_v21 }
 0x212   : > { %v2606_v2 = vrot.slane %v2605_v23, 4 }
 0x214   : > { %v2611_v25 = vsel %vm6813_vm2, %v2606_v2, %v2610_v24  ;;  %v5674_v26 = vpop.f32.mrb[8].mxu0 }
 0x215   : > { %v5229_v5 = vld [vmem:[%s6728_s19 + $0x20] sm:$0xe]  ;;  %5231 = vst [vmem:[%s6728_s19 + $0x24] sm:$0x3] %v2611_v25  ;;  %v2881_v27 = vadd.f32 %v5674_v26, %v6710_v57  ;;  %v2862_v28 = vpop.f32.mrb[9].mxu0 }
 0x216   : > { %v2615_v29 = vsel %vm6808_vm1, %v2605_v23, %v5229_v5  ;;  %v2880_v31 = vadd.f32 %v6710_v57, %v2862_v28 }
 0x217   : > { %5230 = vst [vmem:[%s6728_s19 + $0x20] sm:$0xe] %v2615_v29  ;;  %v2883_v32 = vmax.f32 %v2881_v27, 0.0 }
 0x218   : > { %v2882_v35 = vmax.f32 %v2880_v31, 0.0  ;;  %v5689_v10 = vpop.f32.mrb[8].mxu1 }
 0x219   : > { %v5381_v36 = vpack.c.bf16 %v2883_v32, %v2883_v32  ;;  %v3171_v37 = vadd.f32 %v5689_v10, %v6710_v57  ;;  %v3152_v38 = vpop.f32.mrb[9].mxu1 }
 0x21a   : > { %v5380_v39 = vpack.c.bf16 %v2882_v35, %v2882_v35  ;;  %v3170_v40 = vadd.f32 %v6710_v57, %v3152_v38 }
 0x21b   : > { %v2895_v41 = vsel %vm6724_vm3, %v5381_v36, %v5246_v33  ;;  %v3173_v7 = vmax.f32 %v3171_v37, 0.0  ;;  %v5310_v37 = vld [vmem:[%s6728_s19 + $0x40] sm:$0x1] }
 0x21c   : > { %5247 = vst [vmem:[%s6728_s19 + $0x2c] sm:$0x1] %v2895_v41  ;;  %5245 = vst [vmem:[%s6728_s19 + $0x28] sm:$0xf] %v5380_v39  ;;  %v3172_v42 = vmax.f32 %v3170_v40, 0.0 }
 0x21d   : > { %v5383_v45 = vpack.c.bf16 %v3173_v7, %v3173_v7 }
 0x21e   : > { %v5382_v44 = vpack.c.bf16 %v3172_v42, %v3172_v42 }
 0x21f   : > { %v3189_v48 = vshll.u32 %v5383_v45, 16 }
 0x220   : > { %v3181_v34 = vshrl.u32 %v5382_v44, 16  ;;  %v3184_v47 = vshll.u32 %v5382_v44, 16 }
 0x222   : > { %v3183_v46 = vrot.slane %v3181_v34, 7 }
 0x223   : > { %v5261_v51 = vld [vmem:[%s6728_s19 + $0x2c] sm:$0xf] }
 0x224   : > { %v3186_v49 = vor.u32 %v3184_v47, %v3183_v46  ;;  %v3187_v50 = vrot.slane %v3183_v46, 4 }
 0x226   : > { %v3191_v52 = vsel %vm6772_vm7, %v3187_v50, %v3189_v48  ;;  %v3195_v53 = vsel %vm6777_vm8, %v3186_v49, %v5261_v51 }
 0x227   : > { %5262 = vst [vmem:[%s6728_s19 + $0x2c] sm:$0xf] %v3195_v53  ;;  %5263 = vst [vmem:[%s6728_s19 + $0x30] sm:$0x1] %v3191_v52 }
 0x228   : > { %v5704_v54 = vpop.f32.mrb[10].mxu0 }
 0x229   : > { %v3472_v56 = vadd.f32 %v5704_v54, %v6710_v57  ;;  %v3453_v58 = vpop.f32.mrb[11].mxu0 }
 0x22a   : > { %v3471_v60 = vadd.f32 %v6710_v57, %v3453_v58 }
 0x22b   : > { %v3474_v61 = vmax.f32 %v3472_v56, 0.0 }
 0x22c   : > { %v3473_v62 = vmax.f32 %v3471_v60, 0.0  ;;  %v5719_v63 = vpop.f32.mrb[10].mxu1 }
 0x22d   : > { %v3765_v0 = vadd.f32 %v5719_v63, %v6710_v57  ;;  %v3746_v1 = vpop.f32.mrb[11].mxu1  ;;  %v5385_v4 = vpack.c.bf16 %v3474_v61, %v3474_v61 }
 0x22e   : > { %v5384_v6 = vpack.c.bf16 %v3473_v62, %v3473_v62  ;;  %v3764_v8 = vadd.f32 %v6710_v57, %v3746_v1 }
 0x22f   : > { %v3767_v9 = vmax.f32 %v3765_v0, 0.0  ;;  %v3483_v13 = vrot.slane %v5385_v4, 7 }
 0x230   : > { %v3481_v11 = vrot.slane %v5384_v6, 7  ;;  %v3766_v12 = vmax.f32 %v3764_v8, 0.0 }
 0x231   : > { %v5387_v16 = vpack.c.bf16 %v3767_v9, %v3767_v9 }
 0x232   : > { %v3482_v14 = vrot.slane %v3481_v11, 4  ;;  %5277 = vst [vmem:[%s6728_s19 + $0x30] sm:$0xe] %v3481_v11  ;;  %v5386_v18 = vpack.c.bf16 %v3766_v12, %v3766_v12 }
 0x233   : > { %v3784_v24 = vshll.u32 %v5387_v16, 16  ;;  %v5342_v16 = vld [vmem:[%s6728_s19 + $0x48] sm:$0x3] }
 0x234   : > { %v3484_v20 = vsel %vm6790_vm12, %v3482_v14, %v3483_v13  ;;  %v3775_v21 = vshrl.u32 %v5386_v18, 16  ;;  %v3778_v22 = vshll.u32 %v5386_v18, 16 }
 0x235   : > { %v3489_v23 = vsel %vm6796_vm13, %v3484_v20, %v5278_v15  ;;  %v3786_v5 = vrot.slane %v3784_v24, 7 }
 0x236   : > { %5279 = vst [vmem:[%s6728_s19 + $0x34] sm:$0x3] %v3489_v23  ;;  %v3777_v2 = vrot.slane %v3775_v21, 6  ;;  %v3780_v25 = vrot.slane %v3778_v22, 7 }
 0x238   : > { %v3781_v26 = vor.u32 %v3780_v25, %v3777_v2 }
 0x23a   : > { %v3782_v27 = vrot.slane %v3781_v26, 4 }
 0x23c   : > { %v3787_v28 = vsel %vm6813_vm2, %v3782_v27, %v3786_v5  ;;  %v5734_v29 = vpop.f32.mrb[12].mxu0 }
 0x23d   : > { %v5293_v31 = vld [vmem:[%s6728_s19 + $0x34] sm:$0xe]  ;;  %5295 = vst [vmem:[%s6728_s19 + $0x38] sm:$0x3] %v3787_v28  ;;  %v4068_v32 = vadd.f32 %v5734_v29, %v6710_v57  ;;  %v4049_v33 = vpop.f32.mrb[13].mxu0 }
 0x23e   : > { %v3791_v35 = vsel %vm6808_vm1, %v3781_v26, %v5293_v31  ;;  %v4067_v10 = vadd.f32 %v6710_v57, %v4049_v33 }
 0x23f   : > { %5294 = vst [vmem:[%s6728_s19 + $0x34] sm:$0xe] %v3791_v35  ;;  %v4070_v36 = vmax.f32 %v4068_v32, 0.0 }
 0x240   : > { %v4069_v38 = vmax.f32 %v4067_v10, 0.0 }
 0x241   : > { %v5389_v39 = vpack.c.bf16 %v4070_v36, %v4070_v36 }
 0x242   : > { %v5388_v40 = vpack.c.bf16 %v4069_v38, %v4069_v38 }
 0x243   : > { %v4082_v41 = vsel %vm6724_vm3, %v5389_v39, %v5310_v37 }
 0x244   : > { %5311 = vst [vmem:[%s6728_s19 + $0x40] sm:$0x1] %v4082_v41  ;;  %5309 = vst [vmem:[%s6728_s19 + $0x3c] sm:$0xf] %v5388_v40  ;;  %v5749_v7 = vpop.f32.mrb[12].mxu1 }
 0x245   : > { %v4358_v42 = vadd.f32 %v5749_v7, %v6710_v57  ;;  %v4339_v44 = vpop.f32.mrb[13].mxu1 }
 0x246   : > { %v4357_v45 = vadd.f32 %v6710_v57, %v4339_v44 }
 0x247   : > { %v4360_v34 = vmax.f32 %v4358_v42, 0.0 }
 0x248   : > { %v4359_v46 = vmax.f32 %v4357_v45, 0.0 }
 0x249   : > { %v5391_v48 = vpack.c.bf16 %v4360_v34, %v4360_v34 }
 0x24a   : > { %v5390_v47 = vpack.c.bf16 %v4359_v46, %v4359_v46 }
 0x24b   : > { %v4376_v3 = vshll.u32 %v5391_v48, 16  ;;  %v5325_v54 = vld [vmem:[%s6728_s19 + $0x40] sm:$0xf] }
 0x24c   : > { %v4368_v49 = vshrl.u32 %v5390_v47, 16  ;;  %v4371_v51 = vshll.u32 %v5390_v47, 16 }
 0x24e   : > { %v4370_v50 = vrot.slane %v4368_v49, 7 }
 0x250   : > { %v4373_v52 = vor.u32 %v4371_v51, %v4370_v50  ;;  %v4374_v53 = vrot.slane %v4370_v50, 4 }
 0x252   : > { %v4378_v56 = vsel %vm6772_vm7, %v4374_v53, %v4376_v3  ;;  %v4382_v58 = vsel %vm6777_vm8, %v4373_v52, %v5325_v54 }
 0x253   : > { %5326 = vst [vmem:[%s6728_s19 + $0x40] sm:$0xf] %v4382_v58  ;;  %5327 = vst [vmem:[%s6728_s19 + $0x44] sm:$0x1] %v4378_v56 }
 0x254   : > { %v5764_v60 = vpop.f32.mrb[14].mxu0 }
 0x255   : > { %v4659_v61 = vadd.f32 %v5764_v60, %v6710_v57  ;;  %v4640_v62 = vpop.f32.mrb[15].mxu0 }
 0x256   : > { %v4658_v63 = vadd.f32 %v6710_v57, %v4640_v62 }
 0x257   : > { %v4661_v0 = vmax.f32 %v4659_v61, 0.0 }
 0x258   : > { %v4660_v1 = vmax.f32 %v4658_v63, 0.0  ;;  %v5779_v4 = vpop.f32.mrb[14].mxu1 }
 0x259   : > { %v4952_v6 = vadd.f32 %v5779_v4, %v6710_v57  ;;  %v4933_v30 = vpop.f32.mrb[15].mxu1  ;;  %v5393_v8 = vpack.c.bf16 %v4661_v0, %v4661_v0 }
 0x25a   : > { %v5392_v43 = vpack.c.bf16 %v4660_v1, %v4660_v1  ;;  %v4951_v9 = vadd.f32 %v6710_v57, %v4933_v30 }
 0x25b   : > { %v4954_v11 = vmax.f32 %v4952_v6, 0.0  ;;  %v4670_v14 = vrot.slane %v5393_v8, 7 }
 0x25c   : > { %v4668_v12 = vrot.slane %v5392_v43, 7  ;;  %v4953_v13 = vmax.f32 %v4951_v9, 0.0 }
 0x25d   : > { %v5395_v18 = vpack.c.bf16 %v4954_v11, %v4954_v11 }
 0x25e   : > { %v4669_v15 = vrot.slane %v4668_v12, 4  ;;  %5341 = vst [vmem:[%s6728_s19 + $0x44] sm:$0xe] %v4668_v12  ;;  %v5394_v20 = vpack.c.bf16 %v4953_v13, %v4953_v13 }
 0x25f   : > { %v4971_v24 = vshll.u32 %v5395_v18, 16 }
 0x260   : > { %v4671_v21 = vsel %vm6790_vm12, %v4669_v15, %v4670_v14  ;;  %v4962_v22 = vshrl.u32 %v5394_v20, 16  ;;  %v4965_v23 = vshll.u32 %v5394_v20, 16 }
 0x261   : > { %v4676_v57 = vsel %vm6796_vm13, %v4671_v21, %v5342_v16  ;;  %v4973_v5 = vrot.slane %v4971_v24, 7 }
 0x262   : > { %5343 = vst [vmem:[%s6728_s19 + $0x48] sm:$0x3] %v4676_v57  ;;  %v4964_v2 = vrot.slane %v4962_v22, 6  ;;  %v4967_v25 = vrot.slane %v4965_v23, 7 }
 0x264   : > { %v4968_v26 = vor.u32 %v4967_v25, %v4964_v2 }
 0x266   : > { %v4969_v55 = vrot.slane %v4968_v26, 4 }
 0x268   : > { %v4974_v27 = vsel %vm6813_vm2, %v4969_v55, %v4973_v5 }
 0x269   : > { %v5357_v59 = vld [vmem:[%s6728_s19 + $0x48] sm:$0xe]  ;;  %5359 = vst [vmem:[%s6728_s19 + $0x4c] sm:$0x3] %v4974_v27 }
 0x26a   : > { %v4978_v28 = vsel %vm6808_vm1, %v4968_v26, %v5357_v59 }
 0x26b   : > { %5358 = vst [vmem:[%s6728_s19 + $0x48] sm:$0xe] %v4978_v28 }
 0x26c   : > { %6039 = shalt.err (!%p6036_p11)
}
 0x26d   : > { %s6040_s22 = scalar_lea.hbm %s6926_s5, 1280  ;;  %s6044_s26 = scalar_lea.hbm %s6985_s3, 2560 }
 0x26e   : > { %p6041_p0 = scmp.ne.s32.totalorder %s6926_s5, %s6040_s22  ;;  %p6045_p6 = scmp.lt.u32.totalorder %s6926_s5, %s6985_s3 }
 0x26f   : > { %p6046_p7 = scmp.lt.u32.totalorder %s6044_s26, %s6040_s22  ;;  %p6048_p8 = scmp.lt.u32.totalorder %s6040_s22, %s6926_s5 }
 0x270   : > { %p6042_p4 = pnand %p6041_p0, %p7014_p12 }
 0x271   : > { %p6047_p2 = por %p6046_p7, %p6045_p6 }
 0x272   : > { %p6043_p13 = pneg %p6042_p4 }
 0x273   : > { %p6049_p1 = por %p6048_p8, %p6047_p2 }
 0x275   : > { %p6050_p10 = pnand %p6049_p1, %p6043_p13 }
 0x277   : > { %6053 = shalt.err (!%p6050_p10)
}
 0x278   : > { %s6127_s19 = smov 64   ;;  %s6128_s4 = smov 4  }
 0x279   : > { %5856 = dma.vmem_to_hbm [thread:$0]  (%p7014_p12), %s6928_s21, 1280, %s6926_s5, %s4982_s15, %s6127_s19, %s6127_s19, %s6128_s4  }
 0x27a PF: > { %s5012_s30 = sand.u32 1, %s6092_s12   ;;  %p7015_p3 = scmp.ne.s32.totalorder %s6993_s23, 0 }
 0x27b   : > { %p7016_p5 = scmp.ge.s32.totalorder %s6112_s17, 2  ;;  %s5013_s29 = scalar_lea.sflag [#allocation4], %s5012_s30 }
 0x27d   : > { %p5870_p9 = pnand %p7016_p5, %p7015_p3 }
 0x27f   : > { %6087 = dma.done.wait (!%p5870_p9), %s5013_s29, 1280  }
 0x280   : > { %6089 = vsyncadd (!%p5870_p9), %s5013_s29, 4294966016  ;;  %s20_s17 = sadd.s32 1, %s6112_s17   ;;  %s7017_s12 = smov %s6096_s13 }
 0x281   : > { %p17_p11 = scmp.ge.s32.totalorder %s20_s17, 4   ;;  %s7018_s13 = smov %s6100_s14 }
 0x282   : > { %s7019_s14 = smov %s6295_s6  ;;  %s7020_s15 = smov %s6108_s16 }
 0x283   : > { %s7021_s16 = smov %s7023_s25  ;;  %19 = sbr.rel (!%p17_p11) target bundleno = 7 (0x7), region = 93 }
 0x28a   :  { %5018 = vsyncpa [#allocation3], 1 }
 0x28b   :  { %5020 = vsyncpa [#allocation3 + $0x1], 1 }
 0x28c   :  { %5021 = vsyncpa [#allocation6], 1 }
 0x28d   :  { %5022 = vsyncpa [#allocation4], 1 }
 0x28e   :  { %5024 = vsyncpa [#allocation4 + $0x1], 1 }

</bundles_post_ra>
